<compile_context>
chip_gen: v7x
topology: tpu7x:2x2x1
jax: 0.10.0
libtpu: 0.0.40
codegen_flags: <defaults>
</compile_context>

<pallas_src>
import functools

import jax
import jax.numpy as jnp
from jax.experimental import pallas as pl
from jax.experimental.pallas import tpu as pltpu


def _sigmoid(x):
    # exp lands on the EUP; the reciprocal could also be routed to the EUP with approx=True
    # on v7x — kept exact here so f32 results stay tight against the XLA reference.
    return pl.reciprocal(1.0 + jnp.exp(-x), approx=False)


def _round_up(v, m):
    return ((v + m - 1) // m) * m


# --------------------------------------------------------------------------- kernel A
def _pool_gate_kernel(q1_ref, q2_ref, q3_ref, q4_ref,
                      wa_w1_ref, wa_b1_ref, wa_w2_ref, wa_b2_ref,
                      g_w1_ref, g_b1_ref, g_w2_ref, g_b2_ref,
                      ywa_ref, s_ref,
                      sum_ref, max_ref,
                      *, S, TS, needs_mask):
    t = pl.program_id(1)
    n_t = pl.num_programs(1)

    @pl.when(t == 0)
    def _():
        sum_ref[...] = jnp.zeros_like(sum_ref)
        max_ref[...] = jnp.full(max_ref.shape, -jnp.inf, max_ref.dtype)

    # quadrant tiles, channel-on-sublane / spatial-on-lane: (C, TS)
    q1 = q1_ref[0].astype(jnp.float32)
    q2 = q2_ref[0].astype(jnp.float32)
    q3 = q3_ref[0].astype(jnp.float32)
    q4 = q4_ref[0].astype(jnp.float32)

    # butterfly-factored Haar DWT (the *0.5 is the /2 inside the torch DWT)
    a = q1 + q2
    b = q3 + q4
    c = q2 - q1
    d = q4 - q3
    bands = ((a + b) * 0.5, (b - a) * 0.5, (c + d) * 0.5, (d - c) * 0.5)  # LL, HL, LH, HH

    if needs_mask:
        # lanes beyond the true S are host zero-pad for tiling only; they must not feed the max
        lane = jax.lax.broadcasted_iota(jnp.int32, bands[0].shape, 1)
        valid = (t * TS + lane) < S

    # NOTE: the avg pool deliberately includes the odd-H/W zero pad rows/cols (divide by the
    # full padded S) — this matches the PyTorch module / reference exactly.
    for k in range(4):
        band = bands[k]
        if needs_mask:
            band_sum = jnp.where(valid, band, 0.0)
            band_max = jnp.where(valid, band, -jnp.inf)
        else:
            band_sum = band
            band_max = band
        sum_ref[k] = sum_ref[k] + jnp.sum(band_sum, axis=1, keepdims=True)
        max_ref[k] = jnp.maximum(max_ref[k], jnp.max(band_max, axis=1, keepdims=True))

    @pl.when(t == n_t - 1)
    def _():
        inv_s = 1.0 / float(S)
        avgs = [sum_ref[k] * inv_s for k in range(4)]      # 4 x (C, 1)
        maxs = [max_ref[k] for k in range(4)]              # 4 x (C, 1)

        def first_conv(pooled, w1_ref_, b1_ref_, du):
            # torch Conv(4C->mm,1x1): h[i] = b[i] + sum_{k,c} w[i, k*C+c] * pooled_k[c]
            h = b1_ref_[du]                                # (1, mm)
            for k in range(4):
                h = h + jnp.sum(w1_ref_[du, k] * pooled[k], axis=0, keepdims=True)
            return jnp.maximum(h, 0.0)                     # ReLU

        # ---------------- WALayer gate: per-channel y_wa in (0, 2) ----------------
        def wa_branch(pooled, du):
            h = first_conv(pooled, wa_w1_ref, wa_b1_ref, du)
            return _sigmoid(jnp.sum(wa_w2_ref[du] * h, axis=1, keepdims=True)
                            + wa_b2_ref[du])               # (C, 1)

        y_wa = wa_branch(avgs, 0) + wa_branch(maxs, 1)

        # DWT is linear & per-channel, so pools of DWT(PAD(x * y_wa)) = pools * y_wa.
        # (max-pool shortcut is valid because y_wa = sigmoid + sigmoid > 0 per channel.)
        avgs2 = [avgs[k] * y_wa for k in range(4)]
        maxs2 = [maxs[k] * y_wa for k in range(4)]

        # ---------------- WGB gate over the 4C sub-band channels ----------------
        def g_branch(pooled, du):
            h = first_conv(pooled, g_w1_ref, g_b1_ref, du)
            return [_sigmoid(jnp.sum(g_w2_ref[du, k] * h, axis=1, keepdims=True)
                             + g_b2_ref[du, k]) for k in range(4)]

        g1 = g_branch(avgs2, 0)
        g2 = g_branch(maxs2, 1)

        ywa_ref[0] = y_wa
        for k in range(4):
            # folds: y_wa (WA apply) * gate_k * 0.5 (DWT /2) * 0.5 (IWT /2)
            s_ref[0, k] = y_wa * (g1[k] + g2[k]) * 0.25


# --------------------------------------------------------------------------- kernel B
def _apply_kernel(q1_ref, q2_ref, q3_ref, q4_ref, ywa_ref, s_ref,
                  o1_ref, o2_ref, o3_ref, o4_ref):
    q1 = q1_ref[0].astype(jnp.float32)
    q2 = q2_ref[0].astype(jnp.float32)
    q3 = q3_ref[0].astype(jnp.float32)
    q4 = q4_ref[0].astype(jnp.float32)
    y_wa = ywa_ref[0]                                      # (C, 1)

    # un-normalized Haar combos (DWT/IWT /2 factors are already folded into s)
    a = q1 + q2
    b = q3 + q4
    c = q2 - q1
    d = q4 - q3
    u0 = (a + b) * s_ref[0, 0]
    u1 = (b - a) * s_ref[0, 1]
    u2 = (c + d) * s_ref[0, 2]
    u3 = (d - c) * s_ref[0, 3]

    # butterfly-factored IWT
    pe = u0 - u1
    po = u0 + u1
    re = u3 - u2
    ro = u2 + u3
    h_ee = pe + re       # map[0::2, 0::2]
    h_oe = pe - re       # map[1::2, 0::2]
    h_eo = po - ro       # map[0::2, 1::2]
    h_oo = po + ro       # map[1::2, 1::2]

    # out = (x * y_wa) * sigmoid(map), emitted per quadrant (crop happens on the host)
    dt = o1_ref.dtype
    o1_ref[0] = (q1 * y_wa * _sigmoid(h_ee)).astype(dt)
    o2_ref[0] = (q2 * y_wa * _sigmoid(h_oe)).astype(dt)
    o3_ref[0] = (q3 * y_wa * _sigmoid(h_eo)).astype(dt)
    o4_ref[0] = (q4 * y_wa * _sigmoid(h_oo)).astype(dt)


# --------------------------------------------------------------------------- host glue
def _pack_params(p, C, m_wa, m):
    """Re-layout the torch-style 1x1-conv weights for the channel-on-sublane kernels."""
    def w1_pack(w):                         # (mm, 4C) -> (4, C, mm) per-band columns
        mm = w.shape[0]
        return w.reshape(mm, 4, C).transpose(1, 2, 0)

    wa_w1 = jnp.stack([w1_pack(p['wa1_w1']), w1_pack(p['wa2_w1'])])                # (2,4,C,m_wa)
    wa_b1 = jnp.stack([p['wa1_b1'].reshape(1, m_wa), p['wa2_b1'].reshape(1, m_wa)])
    wa_w2 = jnp.stack([p['wa1_w2'], p['wa2_w2']])                                  # (2,C,m_wa)
    wa_b2 = jnp.stack([p['wa1_b2'].reshape(C, 1), p['wa2_b2'].reshape(C, 1)])
    g_w1 = jnp.stack([w1_pack(p['g1_w1']), w1_pack(p['g2_w1'])])                   # (2,4,C,m)
    g_b1 = jnp.stack([p['g1_b1'].reshape(1, m), p['g2_b1'].reshape(1, m)])
    g_w2 = jnp.stack([p['g1_w2'].reshape(4, C, m), p['g2_w2'].reshape(4, C, m)])   # (2,4,C,m)
    g_b2 = jnp.stack([p['g1_b2'].reshape(4, C, 1), p['g2_b2'].reshape(4, C, 1)])   # (2,4,C,1)
    return [wa_w1, wa_b1, wa_w2, wa_b2, g_w1, g_b1, g_w2, g_b2]


def wgb_wowa_forward(x, params, io_dtype=jnp.float32):
    """x: (B, C, H, W) float32 -> (B, C, H, W) float32.

    io_dtype=jnp.bfloat16 halves quadrant HBM traffic on mem-bound v5e/v6e (math stays f32).
    """
    B, C, H, W = x.shape
    Hd, Wd = H % 2, W % 2
    Hp, Wp = H + Hd, W + Wd
    H2, W2 = Hp // 2, Wp // 2
    S = H2 * W2

    # spatial tile (lanes): multiple of 128, capped so double-buffered (C, TS) blocks fit VMEM
    S128 = _round_up(S, 128)
    ts_cap = max(128, min(4096, ((2 << 20) // (4 * C)) // 128 * 128))
    TS = min(S128, ts_cap)
    S_pad = _round_up(S128, TS)
    n_tiles = S_pad // TS
    needs_mask = (S_pad != S)

    # zero-pad odd H/W (ZeroPad2d((0,Wd,0,Hd))) and de-interleave into 4 (B, C, S_pad)
    # quadrants — channels stay leading, so no NCHW<->NHWC transpose anywhere.
    xp = jnp.pad(x, ((0, 0), (0, 0), (0, Hd), (0, Wd)))

    def quad(dh, dw):
        q = xp[:, :, dh::2, dw::2].reshape(B, C, S)
        if S_pad != S:
            q = jnp.pad(q, ((0, 0), (0, 0), (0, S_pad - S)))
        return q.astype(io_dtype)

    q1, q2, q3, q4 = quad(0, 0), quad(1, 0), quad(0, 1), quad(1, 1)

    m_wa = params['wa1_b1'].shape[0]
    m = params['g1_b1'].shape[0]
    weights = _pack_params(params, C, m_wa, m)

    # scoped-VMEM budget sized to the actual double-buffered block footprint (+headroom),
    # clamped below v7x's 64 MiB physical VMEM.
    vmem_limit = int(min(60 << 20, max(16 << 20, 2 * 8 * C * TS * 4 + (2 << 20))))

    q_spec = pl.BlockSpec((1, C, TS), lambda bi, ti: (bi, 0, ti))
    ywa_spec = pl.BlockSpec((1, C, 1), lambda bi, ti: (bi, 0, 0))
    s_spec = pl.BlockSpec((1, 4, C, 1), lambda bi, ti: (bi, 0, 0, 0))

    def full_spec(shape):
        nd = len(shape)
        return pl.BlockSpec(tuple(shape), lambda bi, ti, _nd=nd: (0,) * _nd)

    # ---- pass 1: tiled pools + tiny gate MLPs -> y_wa and folded per-band scales s ----
    y_wa, s = pl.pallas_call(
        functools.partial(_pool_gate_kernel, S=S, TS=TS, needs_mask=needs_mask),
        grid=(B, n_tiles),
        in_specs=[q_spec] * 4 + [full_spec(w.shape) for w in weights],
        out_specs=(ywa_spec, s_spec),
        out_shape=(jax.ShapeDtypeStruct((B, C, 1), jnp.float32),
                   jax.ShapeDtypeStruct((B, 4, C, 1), jnp.float32)),
        scratch_shapes=[pltpu.VMEM((4, C, 1), jnp.float32),
                        pltpu.VMEM((4, C, 1), jnp.float32)],
        compiler_params=pltpu.CompilerParams(
            dimension_semantics=("parallel", "arbitrary"),
            vmem_limit_bytes=vmem_limit),
    )(q1, q2, q3, q4, *weights)

    # ---- pass 2: tiled elementwise gate-apply (both grid axes parallel for megacore) ----
    o1, o2, o3, o4 = pl.pallas_call(
        _apply_kernel,
        grid=(B, n_tiles),
        in_specs=[q_spec] * 4 + [ywa_spec, s_spec],
        out_specs=(q_spec, q_spec, q_spec, q_spec),
        out_shape=tuple(jax.ShapeDtypeStruct((B, C, S_pad), io_dtype) for _ in range(4)),
        compiler_params=pltpu.CompilerParams(
            dimension_semantics=("parallel", "parallel"),
            vmem_limit_bytes=vmem_limit),
    )(q1, q2, q3, q4, y_wa, s)

    # re-interleave the four quadrants (channel axis untouched -> no final transpose), crop
    def unflat(o):
        return o[:, :, :S].reshape(B, C, H2, W2).astype(jnp.float32)

    ee, oe, eo, oo = unflat(o1), unflat(o2), unflat(o3), unflat(o4)
    full = jnp.stack([jnp.stack([ee, eo], axis=-1),       # even rows: (even col, odd col)
                      jnp.stack([oe, oo], axis=-1)],      # odd rows
                     axis=3)                              # (B, C, H2, 2, W2, 2)
    full = full.reshape(B, C, Hp, Wp)
    return full[:, :, :H, :W]


# --------------------------------------------------------------------------- pure-JAX reference
def _reference_forward(x, p):
    B, C, H, W = x.shape

    def dwt(xx):
        x01 = xx[:, :, 0::2, :] / 2
        x02 = xx[:, :, 1::2, :] / 2
        x1 = x01[:, :, :, 0::2]
        x2 = x02[:, :, :, 0::2]
        x3 = x01[:, :, :, 1::2]
        x4 = x02[:, :, :, 1::2]
        return jnp.concatenate([x1 + x2 + x3 + x4, -x1 - x2 + x3 + x4,
                                -x1 + x2 - x3 + x4, x1 - x2 - x3 + x4], axis=1)

    def iwt(xx):
        c = xx.shape[1] // 4
        x1 = xx[:, 0:c] / 2
        x2 = xx[:, c:2 * c] / 2
        x3 = xx[:, 2 * c:3 * c] / 2
        x4 = xx[:, 3 * c:4 * c] / 2
        h = jnp.zeros((xx.shape[0], c, 2 * xx.shape[2], 2 * xx.shape[3]), jnp.float32)
        h = h.at[:, :, 0::2, 0::2].set(x1 - x2 - x3 + x4)
        h = h.at[:, :, 1::2, 0::2].set(x1 - x2 + x3 - x4)
        h = h.at[:, :, 0::2, 1::2].set(x1 + x2 - x3 - x4)
        h = h.at[:, :, 1::2, 1::2].set(x1 + x2 + x3 + x4)
        return h

    def conv1x1(v, w, b):
        return jnp.einsum('bi,oi->bo', v[:, :, 0, 0], w)[:, :, None, None] + b[None, :, None, None]

    def conv_du(v, w1, b1, w2, b2):
        return jax.nn.sigmoid(conv1x1(jnp.maximum(conv1x1(v, w1, b1), 0.0), w2, b2))

    Hd, Wd = H % 2, W % 2

    # WALayer
    xp = jnp.pad(x, ((0, 0), (0, 0), (0, Hd), (0, Wd)))
    xw = dwt(xp)
    y = (conv_du(jnp.mean(xw, axis=(2, 3), keepdims=True), p['wa1_w1'], p['wa1_b1'], p['wa1_w2'], p['wa1_b2'])
         + conv_du(jnp.max(xw, axis=(2, 3), keepdims=True), p['wa2_w1'], p['wa2_b1'], p['wa2_w2'], p['wa2_b2']))
    xwa = x * y

    # WGB
    xp2 = jnp.pad(xwa, ((0, 0), (0, 0), (0, Hd), (0, Wd)))
    x_ = dwt(xp2)
    y = (conv_du(jnp.mean(x_, axis=(2, 3), keepdims=True), p['g1_w1'], p['g1_b1'], p['g1_w2'], p['g1_b2'])
         + conv_du(jnp.max(x_, axis=(2, 3), keepdims=True), p['g2_w1'], p['g2_b1'], p['g2_w2'], p['g2_b2']))
    y = y * x_
    map_ = iwt(y)[:, :, 0:H, 0:W]
    return xwa * jax.nn.sigmoid(map_)


# --------------------------------------------------------------------------- main
if __name__ == "__main__":
    key = jax.random.PRNGKey(0)
    B, C, H, W = 2, 4, 16, 16
    reduction = 16
    m = (C * 4) // reduction
    if m == 0:
        m = 1
    m_wa = (C * 4) // 16 if (C * 4) // 16 != 0 else 1   # WALayer(channel) default reduction=16

    keys = jax.random.split(key, 16)

    def init(k, shape, scale=0.5):
        return scale * jax.random.normal(k, shape, dtype=jnp.float32)

    params = {
        # WALayer.conv_du1 / conv_du2 : Conv(4C->m_wa,1x1) + ReLU + Conv(m_wa->C,1x1) + Sigmoid
        'wa1_w1': init(keys[0], (m_wa, 4 * C)), 'wa1_b1': init(keys[1], (m_wa,)),
        'wa1_w2': init(keys[2], (C, m_wa)),     'wa1_b2': init(keys[3], (C,)),
        'wa2_w1': init(keys[4], (m_wa, 4 * C)), 'wa2_b1': init(keys[5], (m_wa,)),
        'wa2_w2': init(keys[6], (C, m_wa)),     'wa2_b2': init(keys[7], (C,)),
        # WGB_woWA.conv_du1 / conv_du2 : Conv(4C->m,1x1) + ReLU + Conv(m->4C,1x1) + Sigmoid
        'g1_w1': init(keys[8], (m, 4 * C)),  'g1_b1': init(keys[9], (m,)),
        'g1_w2': init(keys[10], (4 * C, m)), 'g1_b2': init(keys[11], (4 * C,)),
        'g2_w1': init(keys[12], (m, 4 * C)), 'g2_b1': init(keys[13], (m,)),
        'g2_w2': init(keys[14], (4 * C, m)), 'g2_b2': init(keys[15], (4 * C,)),
    }

    x = jax.random.normal(jax.random.fold_in(key, 123), (B, C, H, W), dtype=jnp.float32)

    fwd = jax.jit(wgb_wowa_forward)
    out = jax.block_until_ready(fwd(x, params))
    ref = jax.block_until_ready(_reference_forward(x, params))
    assert out.shape == (B, C, H, W)
    err = float(jnp.max(jnp.abs(out - ref)))
    assert jnp.allclose(out, ref, atol=1e-5, rtol=1e-4), f"max abs err {err}"
    print("KERNEL_OK")
</pallas_src>

<mosaic_0001>
module attributes {stable_mosaic.version = 11 : i64} {
  func.func @_apply_kernel(%arg0: i32, %arg1: i32, %arg2: memref<1x4x128xf32, #tpu.memory_space<vmem>>, %arg3: memref<1x4x128xf32, #tpu.memory_space<vmem>>, %arg4: memref<1x4x128xf32, #tpu.memory_space<vmem>>, %arg5: memref<1x4x128xf32, #tpu.memory_space<vmem>>, %arg6: memref<1x4x1xf32, #tpu.memory_space<vmem>>, %arg7: memref<1x4x4x1xf32, #tpu.memory_space<vmem>>, %arg8: memref<1x4x128xf32, #tpu.memory_space<vmem>>, %arg9: memref<1x4x128xf32, #tpu.memory_space<vmem>>, %arg10: memref<1x4x128xf32, #tpu.memory_space<vmem>>, %arg11: memref<1x4x128xf32, #tpu.memory_space<vmem>>) attributes {dimension_semantics = [#tpu.dimension_semantics<parallel>, #tpu.dimension_semantics<parallel>], iteration_bounds = array<i64: 2, 1>, scalar_prefetch = 0 : i64, scratch_operands = 0 : i64, tpu.core_type = #tpu.core_type<tc>, window_params = [{transform_indices = @transform_0, window_bounds = array<i64: 1, 4, 128>}, {transform_indices = @transform_1, window_bounds = array<i64: 1, 4, 128>}, {transform_indices = @transform_2, window_bounds = array<i64: 1, 4, 128>}, {transform_indices = @transform_3, window_bounds = array<i64: 1, 4, 128>}, {transform_indices = @transform_4, window_bounds = array<i64: 1, 4, 1>}, {transform_indices = @transform_5, window_bounds = array<i64: 1, 4, 4, 1>}, {transform_indices = @transform_6, window_bounds = array<i64: 1, 4, 128>}, {transform_indices = @transform_7, window_bounds = array<i64: 1, 4, 128>}, {transform_indices = @transform_8, window_bounds = array<i64: 1, 4, 128>}, {transform_indices = @transform_9, window_bounds = array<i64: 1, 4, 128>}]} {
    %c0 = arith.constant 0 : index
    %c0_0 = arith.constant 0 : index
    %c0_1 = arith.constant 0 : index
    %0 = vector.load %arg2[%c0, %c0_0, %c0_1] : memref<1x4x128xf32, #tpu.memory_space<vmem>>, vector<1x4x128xf32>
    %1 = vector.shape_cast %0 : vector<1x4x128xf32> to vector<4x128xf32>
    %c0_2 = arith.constant 0 : index
    %c0_3 = arith.constant 0 : index
    %c0_4 = arith.constant 0 : index
    %2 = vector.load %arg3[%c0_2, %c0_3, %c0_4] : memref<1x4x128xf32, #tpu.memory_space<vmem>>, vector<1x4x128xf32>
    %3 = vector.shape_cast %2 : vector<1x4x128xf32> to vector<4x128xf32>
    %c0_5 = arith.constant 0 : index
    %c0_6 = arith.constant 0 : index
    %c0_7 = arith.constant 0 : index
    %4 = vector.load %arg4[%c0_5, %c0_6, %c0_7] : memref<1x4x128xf32, #tpu.memory_space<vmem>>, vector<1x4x128xf32>
    %5 = vector.shape_cast %4 : vector<1x4x128xf32> to vector<4x128xf32>
    %c0_8 = arith.constant 0 : index
    %c0_9 = arith.constant 0 : index
    %c0_10 = arith.constant 0 : index
    %6 = vector.load %arg5[%c0_8, %c0_9, %c0_10] : memref<1x4x128xf32, #tpu.memory_space<vmem>>, vector<1x4x128xf32>
    %7 = vector.shape_cast %6 : vector<1x4x128xf32> to vector<4x128xf32>
    %c0_11 = arith.constant 0 : index
    %c0_12 = arith.constant 0 : index
    %c0_13 = arith.constant 0 : index
    %8 = vector.load %arg6[%c0_11, %c0_12, %c0_13] : memref<1x4x1xf32, #tpu.memory_space<vmem>>, vector<1x4x1xf32>
    %9 = vector.shape_cast %8 : vector<1x4x1xf32> to vector<4x1xf32>
    %10 = arith.addf %1, %3 : vector<4x128xf32>
    %11 = arith.addf %5, %7 : vector<4x128xf32>
    %12 = arith.subf %3, %1 : vector<4x128xf32>
    %13 = arith.subf %7, %5 : vector<4x128xf32>
    %14 = arith.addf %10, %11 : vector<4x128xf32>
    %c0_14 = arith.constant 0 : index
    %c0_15 = arith.constant 0 : index
    %c0_16 = arith.constant 0 : index
    %c0_17 = arith.constant 0 : index
    %15 = vector.load %arg7[%c0_14, %c0_15, %c0_16, %c0_17] : memref<1x4x4x1xf32, #tpu.memory_space<vmem>>, vector<1x1x4x1xf32>
    %16 = vector.shape_cast %15 : vector<1x1x4x1xf32> to vector<4x1xf32>
    %17 = vector.broadcast %16 : vector<4x1xf32> to vector<4x128xf32>
    %18 = arith.mulf %14, %17 : vector<4x128xf32>
    %19 = arith.subf %11, %10 : vector<4x128xf32>
    %c0_18 = arith.constant 0 : index
    %c1 = arith.constant 1 : index
    %c0_19 = arith.constant 0 : index
    %c0_20 = arith.constant 0 : index
    %20 = vector.load %arg7[%c0_18, %c1, %c0_19, %c0_20] : memref<1x4x4x1xf32, #tpu.memory_space<vmem>>, vector<1x1x4x1xf32>
    %21 = vector.shape_cast %20 : vector<1x1x4x1xf32> to vector<4x1xf32>
    %22 = vector.broadcast %21 : vector<4x1xf32> to vector<4x128xf32>
    %23 = arith.mulf %19, %22 : vector<4x128xf32>
    %24 = arith.addf %12, %13 : vector<4x128xf32>
    %c0_21 = arith.constant 0 : index
    %c2 = arith.constant 2 : index
    %c0_22 = arith.constant 0 : index
    %c0_23 = arith.constant 0 : index
    %25 = vector.load %arg7[%c0_21, %c2, %c0_22, %c0_23] : memref<1x4x4x1xf32, #tpu.memory_space<vmem>>, vector<1x1x4x1xf32>
    %26 = vector.shape_cast %25 : vector<1x1x4x1xf32> to vector<4x1xf32>
    %27 = vector.broadcast %26 : vector<4x1xf32> to vector<4x128xf32>
    %28 = arith.mulf %24, %27 : vector<4x128xf32>
    %29 = arith.subf %13, %12 : vector<4x128xf32>
    %c0_24 = arith.constant 0 : index
    %c3 = arith.constant 3 : index
    %c0_25 = arith.constant 0 : index
    %c0_26 = arith.constant 0 : index
    %30 = vector.load %arg7[%c0_24, %c3, %c0_25, %c0_26] : memref<1x4x4x1xf32, #tpu.memory_space<vmem>>, vector<1x1x4x1xf32>
    %31 = vector.shape_cast %30 : vector<1x1x4x1xf32> to vector<4x1xf32>
    %32 = vector.broadcast %31 : vector<4x1xf32> to vector<4x128xf32>
    %33 = arith.mulf %29, %32 : vector<4x128xf32>
    %34 = arith.subf %18, %23 : vector<4x128xf32>
    %35 = arith.addf %18, %23 : vector<4x128xf32>
    %36 = arith.subf %33, %28 : vector<4x128xf32>
    %37 = arith.addf %28, %33 : vector<4x128xf32>
    %38 = arith.addf %34, %36 : vector<4x128xf32>
    %39 = arith.subf %34, %36 : vector<4x128xf32>
    %40 = arith.subf %35, %37 : vector<4x128xf32>
    %41 = arith.addf %35, %37 : vector<4x128xf32>
    %42 = vector.broadcast %9 : vector<4x1xf32> to vector<4x128xf32>
    %43 = arith.mulf %1, %42 : vector<4x128xf32>
    %cst = arith.constant 0.000000e+00 : f32
    %44 = vector.broadcast %cst : f32 to vector<4x128xf32>
    %45 = arith.subf %44, %38 : vector<4x128xf32>
    %46 = math.exp %45 : vector<4x128xf32>
    %cst_27 = arith.constant 1.000000e+00 : f32
    %47 = vector.broadcast %cst_27 : f32 to vector<4x128xf32>
    %48 = arith.addf %47, %46 : vector<4x128xf32>
    %49 = tpu.reciprocal %48 : vector<4x128xf32> -> vector<4x128xf32>
    %50 = arith.mulf %43, %49 : vector<4x128xf32>
    %c0_28 = arith.constant 0 : index
    %c0_29 = arith.constant 0 : index
    %c0_30 = arith.constant 0 : index
    %51 = vector.load %arg8[%c0_28, %c0_29, %c0_30] : memref<1x4x128xf32, #tpu.memory_space<vmem>>, vector<1x4x128xf32>
    %52 = vector.shape_cast %51 : vector<1x4x128xf32> to vector<4x128xf32>
    %53 = vector.shape_cast %50 : vector<4x128xf32> to vector<1x4x128xf32>
    tpu.vector_store %arg8[%c0_28, %c0_29, %c0_30], %53 {strides = array<i32>} : memref<1x4x128xf32, #tpu.memory_space<vmem>>, vector<1x4x128xf32>,
    %54 = vector.broadcast %9 : vector<4x1xf32> to vector<4x128xf32>
    %55 = arith.mulf %3, %54 : vector<4x128xf32>
    %cst_31 = arith.constant 0.000000e+00 : f32
    %56 = vector.broadcast %cst_31 : f32 to vector<4x128xf32>
    %57 = arith.subf %56, %39 : vector<4x128xf32>
    %58 = math.exp %57 : vector<4x128xf32>
    %cst_32 = arith.constant 1.000000e+00 : f32
    %59 = vector.broadcast %cst_32 : f32 to vector<4x128xf32>
    %60 = arith.addf %59, %58 : vector<4x128xf32>
    %61 = tpu.reciprocal %60 : vector<4x128xf32> -> vector<4x128xf32>
    %62 = arith.mulf %55, %61 : vector<4x128xf32>
    %c0_33 = arith.constant 0 : index
    %c0_34 = arith.constant 0 : index
    %c0_35 = arith.constant 0 : index
    %63 = vector.load %arg9[%c0_33, %c0_34, %c0_35] : memref<1x4x128xf32, #tpu.memory_space<vmem>>, vector<1x4x128xf32>
    %64 = vector.shape_cast %63 : vector<1x4x128xf32> to vector<4x128xf32>
    %65 = vector.shape_cast %62 : vector<4x128xf32> to vector<1x4x128xf32>
    tpu.vector_store %arg9[%c0_33, %c0_34, %c0_35], %65 {strides = array<i32>} : memref<1x4x128xf32, #tpu.memory_space<vmem>>, vector<1x4x128xf32>,
    %66 = vector.broadcast %9 : vector<4x1xf32> to vector<4x128xf32>
    %67 = arith.mulf %5, %66 : vector<4x128xf32>
    %cst_36 = arith.constant 0.000000e+00 : f32
    %68 = vector.broadcast %cst_36 : f32 to vector<4x128xf32>
    %69 = arith.subf %68, %40 : vector<4x128xf32>
    %70 = math.exp %69 : vector<4x128xf32>
    %cst_37 = arith.constant 1.000000e+00 : f32
    %71 = vector.broadcast %cst_37 : f32 to vector<4x128xf32>
    %72 = arith.addf %71, %70 : vector<4x128xf32>
    %73 = tpu.reciprocal %72 : vector<4x128xf32> -> vector<4x128xf32>
    %74 = arith.mulf %67, %73 : vector<4x128xf32>
    %c0_38 = arith.constant 0 : index
    %c0_39 = arith.constant 0 : index
    %c0_40 = arith.constant 0 : index
    %75 = vector.load %arg10[%c0_38, %c0_39, %c0_40] : memref<1x4x128xf32, #tpu.memory_space<vmem>>, vector<1x4x128xf32>
    %76 = vector.shape_cast %75 : vector<1x4x128xf32> to vector<4x128xf32>
    %77 = vector.shape_cast %74 : vector<4x128xf32> to vector<1x4x128xf32>
    tpu.vector_store %arg10[%c0_38, %c0_39, %c0_40], %77 {strides = array<i32>} : memref<1x4x128xf32, #tpu.memory_space<vmem>>, vector<1x4x128xf32>,
    %78 = vector.broadcast %9 : vector<4x1xf32> to vector<4x128xf32>
    %79 = arith.mulf %7, %78 : vector<4x128xf32>
    %cst_41 = arith.constant 0.000000e+00 : f32
    %80 = vector.broadcast %cst_41 : f32 to vector<4x128xf32>
    %81 = arith.subf %80, %41 : vector<4x128xf32>
    %82 = math.exp %81 : vector<4x128xf32>
    %cst_42 = arith.constant 1.000000e+00 : f32
    %83 = vector.broadcast %cst_42 : f32 to vector<4x128xf32>
    %84 = arith.addf %83, %82 : vector<4x128xf32>
    %85 = tpu.reciprocal %84 : vector<4x128xf32> -> vector<4x128xf32>
    %86 = arith.mulf %79, %85 : vector<4x128xf32>
    %c0_43 = arith.constant 0 : index
    %c0_44 = arith.constant 0 : index
    %c0_45 = arith.constant 0 : index
    %87 = vector.load %arg11[%c0_43, %c0_44, %c0_45] : memref<1x4x128xf32, #tpu.memory_space<vmem>>, vector<1x4x128xf32>
    %88 = vector.shape_cast %87 : vector<1x4x128xf32> to vector<4x128xf32>
    %89 = vector.shape_cast %86 : vector<4x128xf32> to vector<1x4x128xf32>
    tpu.vector_store %arg11[%c0_43, %c0_44, %c0_45], %89 {strides = array<i32>} : memref<1x4x128xf32, #tpu.memory_space<vmem>>, vector<1x4x128xf32>,
    return
  }
  func.func @transform_0(%arg0: i32, %arg1: i32) -> (i32, i32, i32) {
    %c0_i32 = arith.constant 0 : i32
    %c0_i32_0 = arith.constant 0 : i32
    return %arg0, %c0_i32, %arg1 : i32, i32, i32
  }
  func.func @transform_1(%arg0: i32, %arg1: i32) -> (i32, i32, i32) {
    %c0_i32 = arith.constant 0 : i32
    %c0_i32_0 = arith.constant 0 : i32
    return %arg0, %c0_i32, %arg1 : i32, i32, i32
  }
  func.func @transform_2(%arg0: i32, %arg1: i32) -> (i32, i32, i32) {
    %c0_i32 = arith.constant 0 : i32
    %c0_i32_0 = arith.constant 0 : i32
    return %arg0, %c0_i32, %arg1 : i32, i32, i32
  }
  func.func @transform_3(%arg0: i32, %arg1: i32) -> (i32, i32, i32) {
    %c0_i32 = arith.constant 0 : i32
    %c0_i32_0 = arith.constant 0 : i32
    return %arg0, %c0_i32, %arg1 : i32, i32, i32
  }
  func.func @transform_4(%arg0: i32, %arg1: i32) -> (i32, i32, i32) {
    %c0_i32 = arith.constant 0 : i32
    %c0_i32_0 = arith.constant 0 : i32
    %c0_i32_1 = arith.constant 0 : i32
    return %arg0, %c0_i32, %c0_i32_0 : i32, i32, i32
  }
  func.func @transform_5(%arg0: i32, %arg1: i32) -> (i32, i32, i32, i32) {
    %c0_i32 = arith.constant 0 : i32
    %c0_i32_0 = arith.constant 0 : i32
    %c0_i32_1 = arith.constant 0 : i32
    %c0_i32_2 = arith.constant 0 : i32
    return %arg0, %c0_i32, %c0_i32_0, %c0_i32_1 : i32, i32, i32, i32
  }
  func.func @transform_6(%arg0: i32, %arg1: i32) -> (i32, i32, i32) {
    %c0_i32 = arith.constant 0 : i32
    %c0_i32_0 = arith.constant 0 : i32
    return %arg0, %c0_i32, %arg1 : i32, i32, i32
  }
  func.func @transform_7(%arg0: i32, %arg1: i32) -> (i32, i32, i32) {
    %c0_i32 = arith.constant 0 : i32
    %c0_i32_0 = arith.constant 0 : i32
    return %arg0, %c0_i32, %arg1 : i32, i32, i32
  }
  func.func @transform_8(%arg0: i32, %arg1: i32) -> (i32, i32, i32) {
    %c0_i32 = arith.constant 0 : i32
    %c0_i32_0 = arith.constant 0 : i32
    return %arg0, %c0_i32, %arg1 : i32, i32, i32
  }
  func.func @transform_9(%arg0: i32, %arg1: i32) -> (i32, i32, i32) {
    %c0_i32 = arith.constant 0 : i32
    %c0_i32_0 = arith.constant 0 : i32
    return %arg0, %c0_i32, %arg1 : i32, i32, i32
  }
}

module attributes {stable_mosaic.version = 11 : i64} {
  func.func @_pool_gate_kernel(%arg0: i32, %arg1: i32, %arg2: memref<1x4x128xf32, #tpu.memory_space<vmem>>, %arg3: memref<1x4x128xf32, #tpu.memory_space<vmem>>, %arg4: memref<1x4x128xf32, #tpu.memory_space<vmem>>, %arg5: memref<1x4x128xf32, #tpu.memory_space<vmem>>, %arg6: memref<2x4x4x1xf32, #tpu.memory_space<vmem>>, %arg7: memref<2x1x1xf32, #tpu.memory_space<vmem>>, %arg8: memref<2x4x1xf32, #tpu.memory_space<vmem>>, %arg9: memref<2x4x1xf32, #tpu.memory_space<vmem>>, %arg10: memref<2x4x4x1xf32, #tpu.memory_space<vmem>>, %arg11: memref<2x1x1xf32, #tpu.memory_space<vmem>>, %arg12: memref<2x4x4x1xf32, #tpu.memory_space<vmem>>, %arg13: memref<2x4x4x1xf32, #tpu.memory_space<vmem>>, %arg14: memref<1x4x1xf32, #tpu.memory_space<vmem>>, %arg15: memref<1x4x4x1xf32, #tpu.memory_space<vmem>>, %arg16: memref<4x4x1xf32, #tpu.memory_space<vmem>>, %arg17: memref<4x4x1xf32, #tpu.memory_space<vmem>>) attributes {dimension_semantics = [#tpu.dimension_semantics<parallel>, #tpu.dimension_semantics<arbitrary>], iteration_bounds = array<i64: 2, 1>, scalar_prefetch = 0 : i64, scratch_operands = 2 : i64, tpu.core_type = #tpu.core_type<tc>, window_params = [{transform_indices = @transform_0, window_bounds = array<i64: 1, 4, 128>}, {transform_indices = @transform_1, window_bounds = array<i64: 1, 4, 128>}, {transform_indices = @transform_2, window_bounds = array<i64: 1, 4, 128>}, {transform_indices = @transform_3, window_bounds = array<i64: 1, 4, 128>}, {pipeline_mode = #tpu.pipeline_mode<synchronous>, transform_indices = @transform_4, window_bounds = array<i64: 2, 4, 4, 1>}, {pipeline_mode = #tpu.pipeline_mode<synchronous>, transform_indices = @transform_5, window_bounds = array<i64: 2, 1, 1>}, {pipeline_mode = #tpu.pipeline_mode<synchronous>, transform_indices = @transform_6, window_bounds = array<i64: 2, 4, 1>}, {pipeline_mode = #tpu.pipeline_mode<synchronous>, transform_indices = @transform_7, window_bounds = array<i64: 2, 4, 1>}, {pipeline_mode = #tpu.pipeline_mode<synchronous>, transform_indices = @transform_8, window_bounds = array<i64: 2, 4, 4, 1>}, {pipeline_mode = #tpu.pipeline_mode<synchronous>, transform_indices = @transform_9, window_bounds = array<i64: 2, 1, 1>}, {pipeline_mode = #tpu.pipeline_mode<synchronous>, transform_indices = @transform_10, window_bounds = array<i64: 2, 4, 4, 1>}, {pipeline_mode = #tpu.pipeline_mode<synchronous>, transform_indices = @transform_11, window_bounds = array<i64: 2, 4, 4, 1>}, {transform_indices = @transform_12, window_bounds = array<i64: 1, 4, 1>}, {transform_indices = @transform_13, window_bounds = array<i64: 1, 4, 4, 1>}]} {
    %c0_i32 = arith.constant 0 : i32
    %0 = arith.cmpi eq, %arg1, %c0_i32 : i32
    %1 = arith.extui %0 : i1 to i32
    %c0_i32_0 = arith.constant 0 : i32
    %2 = arith.cmpi ne, %1, %c0_i32_0 : i32
    scf.if %2 {
      %cst_78 = arith.constant 0.000000e+00 : f32
      %116 = vector.broadcast %cst_78 : f32 to vector<4x4x1xf32>
      %c0_79 = arith.constant 0 : index
      %c0_80 = arith.constant 0 : index
      %c0_81 = arith.constant 0 : index
      %117 = vector.load %arg16[%c0_79, %c0_80, %c0_81] : memref<4x4x1xf32, #tpu.memory_space<vmem>>, vector<4x4x1xf32>
      tpu.vector_store %arg16[%c0_79, %c0_80, %c0_81], %116 {strides = array<i32>} : memref<4x4x1xf32, #tpu.memory_space<vmem>>, vector<4x4x1xf32>,
      %cst_82 = arith.constant 0xFF800000 : f32
      %118 = vector.broadcast %cst_82 : f32 to vector<4x4x1xf32>
      %c0_83 = arith.constant 0 : index
      %c0_84 = arith.constant 0 : index
      %c0_85 = arith.constant 0 : index
      %119 = vector.load %arg17[%c0_83, %c0_84, %c0_85] : memref<4x4x1xf32, #tpu.memory_space<vmem>>, vector<4x4x1xf32>
      tpu.vector_store %arg17[%c0_83, %c0_84, %c0_85], %118 {strides = array<i32>} : memref<4x4x1xf32, #tpu.memory_space<vmem>>, vector<4x4x1xf32>,
    } else {
    }
    %c0 = arith.constant 0 : index
    %c0_1 = arith.constant 0 : index
    %c0_2 = arith.constant 0 : index
    %3 = vector.load %arg2[%c0, %c0_1, %c0_2] : memref<1x4x128xf32, #tpu.memory_space<vmem>>, vector<1x4x128xf32>
    %4 = vector.shape_cast %3 : vector<1x4x128xf32> to vector<4x128xf32>
    %c0_3 = arith.constant 0 : index
    %c0_4 = arith.constant 0 : index
    %c0_5 = arith.constant 0 : index
    %5 = vector.load %arg3[%c0_3, %c0_4, %c0_5] : memref<1x4x128xf32, #tpu.memory_space<vmem>>, vector<1x4x128xf32>
    %6 = vector.shape_cast %5 : vector<1x4x128xf32> to vector<4x128xf32>
    %c0_6 = arith.constant 0 : index
    %c0_7 = arith.constant 0 : index
    %c0_8 = arith.constant 0 : index
    %7 = vector.load %arg4[%c0_6, %c0_7, %c0_8] : memref<1x4x128xf32, #tpu.memory_space<vmem>>, vector<1x4x128xf32>
    %8 = vector.shape_cast %7 : vector<1x4x128xf32> to vector<4x128xf32>
    %c0_9 = arith.constant 0 : index
    %c0_10 = arith.constant 0 : index
    %c0_11 = arith.constant 0 : index
    %9 = vector.load %arg5[%c0_9, %c0_10, %c0_11] : memref<1x4x128xf32, #tpu.memory_space<vmem>>, vector<1x4x128xf32>
    %10 = vector.shape_cast %9 : vector<1x4x128xf32> to vector<4x128xf32>
    %11 = arith.addf %4, %6 : vector<4x128xf32>
    %12 = arith.addf %8, %10 : vector<4x128xf32>
    %13 = arith.subf %6, %4 : vector<4x128xf32>
    %14 = arith.subf %10, %8 : vector<4x128xf32>
    %15 = arith.addf %11, %12 : vector<4x128xf32>
    %cst = arith.constant 5.000000e-01 : f32
    %16 = vector.broadcast %cst : f32 to vector<4x128xf32>
    %17 = arith.mulf %15, %16 : vector<4x128xf32>
    %18 = arith.subf %12, %11 : vector<4x128xf32>
    %cst_12 = arith.constant 5.000000e-01 : f32
    %19 = vector.broadcast %cst_12 : f32 to vector<4x128xf32>
    %20 = arith.mulf %18, %19 : vector<4x128xf32>
    %21 = arith.addf %13, %14 : vector<4x128xf32>
    %cst_13 = arith.constant 5.000000e-01 : f32
    %22 = vector.broadcast %cst_13 : f32 to vector<4x128xf32>
    %23 = arith.mulf %21, %22 : vector<4x128xf32>
    %24 = arith.subf %14, %13 : vector<4x128xf32>
    %cst_14 = arith.constant 5.000000e-01 : f32
    %25 = vector.broadcast %cst_14 : f32 to vector<4x128xf32>
    %26 = arith.mulf %24, %25 : vector<4x128xf32>
    %27 = tpu.iota {dimensions = array<i32: 1>} : vector<4x128xi32>
    %c128_i32 = arith.constant 128 : i32
    %28 = arith.muli %arg1, %c128_i32 : i32
    %29 = vector.broadcast %28 : i32 to vector<4x128xi32>
    %30 = arith.addi %29, %27 : vector<4x128xi32>
    %c64_i32 = arith.constant 64 : i32
    %31 = vector.broadcast %c64_i32 : i32 to vector<4x128xi32>
    %32 = arith.cmpi slt, %30, %31 : vector<4x128xi32>
    %cst_15 = arith.constant 0.000000e+00 : f32
    %33 = vector.broadcast %cst_15 : f32 to vector<4x128xf32>
    %34 = arith.select %32, %17, %33 : vector<4x128xi1>, vector<4x128xf32>
    %cst_16 = arith.constant 0xFF800000 : f32
    %35 = vector.broadcast %cst_16 : f32 to vector<4x128xf32>
    %36 = arith.select %32, %17, %35 : vector<4x128xi1>, vector<4x128xf32>
    %c0_17 = arith.constant 0 : index
    %c0_18 = arith.constant 0 : index
    %c0_19 = arith.constant 0 : index
    %37 = vector.load %arg16[%c0_17, %c0_18, %c0_19] : memref<4x4x1xf32, #tpu.memory_space<vmem>>, vector<1x4x1xf32>
    %38 = vector.shape_cast %37 : vector<1x4x1xf32> to vector<4x1xf32>
    %cst_20 = arith.constant dense<0.000000e+00> : vector<4xf32>
    %39 = vector.multi_reduction <add>, %34, %cst_20 [1] : vector<4x128xf32> to vector<4xf32>
    %40 = vector.shape_cast %39 : vector<4xf32> to vector<4x1xf32>
    %41 = arith.addf %38, %40 : vector<4x1xf32>
    %c0_21 = arith.constant 0 : index
    %c0_22 = arith.constant 0 : index
    %c0_23 = arith.constant 0 : index
    %42 = vector.load %arg16[%c0_21, %c0_22, %c0_23] : memref<4x4x1xf32, #tpu.memory_space<vmem>>, vector<1x4x1xf32>
    %43 = vector.shape_cast %42 : vector<1x4x1xf32> to vector<4x1xf32>
    %44 = vector.shape_cast %41 : vector<4x1xf32> to vector<1x4x1xf32>
    tpu.vector_store %arg16[%c0_21, %c0_22, %c0_23], %44 {strides = array<i32>} : memref<4x4x1xf32, #tpu.memory_space<vmem>>, vector<1x4x1xf32>,
    %c0_24 = arith.constant 0 : index
    %c0_25 = arith.constant 0 : index
    %c0_26 = arith.constant 0 : index
    %45 = vector.load %arg17[%c0_24, %c0_25, %c0_26] : memref<4x4x1xf32, #tpu.memory_space<vmem>>, vector<1x4x1xf32>
    %46 = vector.shape_cast %45 : vector<1x4x1xf32> to vector<4x1xf32>
    %cst_27 = arith.constant dense<0xFF800000> : vector<4xf32>
    %47 = vector.multi_reduction <maximumf>, %36, %cst_27 [1] : vector<4x128xf32> to vector<4xf32>
    %48 = vector.shape_cast %47 : vector<4xf32> to vector<4x1xf32>
    %49 = arith.maximumf %46, %48 : vector<4x1xf32>
    %c0_28 = arith.constant 0 : index
    %c0_29 = arith.constant 0 : index
    %c0_30 = arith.constant 0 : index
    %50 = vector.load %arg17[%c0_28, %c0_29, %c0_30] : memref<4x4x1xf32, #tpu.memory_space<vmem>>, vector<1x4x1xf32>
    %51 = vector.shape_cast %50 : vector<1x4x1xf32> to vector<4x1xf32>
    %52 = vector.shape_cast %49 : vector<4x1xf32> to vector<1x4x1xf32>
    tpu.vector_store %arg17[%c0_28, %c0_29, %c0_30], %52 {strides = array<i32>} : memref<4x4x1xf32, #tpu.memory_space<vmem>>, vector<1x4x1xf32>,
    %cst_31 = arith.constant 0.000000e+00 : f32
    %53 = vector.broadcast %cst_31 : f32 to vector<4x128xf32>
    %54 = arith.select %32, %20, %53 : vector<4x128xi1>, vector<4x128xf32>
    %cst_32 = arith.constant 0xFF800000 : f32
    %55 = vector.broadcast %cst_32 : f32 to vector<4x128xf32>
    %56 = arith.select %32, %20, %55 : vector<4x128xi1>, vector<4x128xf32>
    %c1 = arith.constant 1 : index
    %c0_33 = arith.constant 0 : index
    %c0_34 = arith.constant 0 : index
    %57 = vector.load %arg16[%c1, %c0_33, %c0_34] : memref<4x4x1xf32, #tpu.memory_space<vmem>>, vector<1x4x1xf32>
    %58 = vector.shape_cast %57 : vector<1x4x1xf32> to vector<4x1xf32>
    %cst_35 = arith.constant dense<0.000000e+00> : vector<4xf32>
    %59 = vector.multi_reduction <add>, %54, %cst_35 [1] : vector<4x128xf32> to vector<4xf32>
    %60 = vector.shape_cast %59 : vector<4xf32> to vector<4x1xf32>
    %61 = arith.addf %58, %60 : vector<4x1xf32>
    %c1_36 = arith.constant 1 : index
    %c0_37 = arith.constant 0 : index
    %c0_38 = arith.constant 0 : index
    %62 = vector.load %arg16[%c1_36, %c0_37, %c0_38] : memref<4x4x1xf32, #tpu.memory_space<vmem>>, vector<1x4x1xf32>
    %63 = vector.shape_cast %62 : vector<1x4x1xf32> to vector<4x1xf32>
    %64 = vector.shape_cast %61 : vector<4x1xf32> to vector<1x4x1xf32>
    tpu.vector_store %arg16[%c1_36, %c0_37, %c0_38], %64 {strides = array<i32>} : memref<4x4x1xf32, #tpu.memory_space<vmem>>, vector<1x4x1xf32>,
    %c1_39 = arith.constant 1 : index
    %c0_40 = arith.constant 0 : index
    %c0_41 = arith.constant 0 : index
    %65 = vector.load %arg17[%c1_39, %c0_40, %c0_41] : memref<4x4x1xf32, #tpu.memory_space<vmem>>, vector<1x4x1xf32>
    %66 = vector.shape_cast %65 : vector<1x4x1xf32> to vector<4x1xf32>
    %cst_42 = arith.constant dense<0xFF800000> : vector<4xf32>
    %67 = vector.multi_reduction <maximumf>, %56, %cst_42 [1] : vector<4x128xf32> to vector<4xf32>
    %68 = vector.shape_cast %67 : vector<4xf32> to vector<4x1xf32>
    %69 = arith.maximumf %66, %68 : vector<4x1xf32>
    %c1_43 = arith.constant 1 : index
    %c0_44 = arith.constant 0 : index
    %c0_45 = arith.constant 0 : index
    %70 = vector.load %arg17[%c1_43, %c0_44, %c0_45] : memref<4x4x1xf32, #tpu.memory_space<vmem>>, vector<1x4x1xf32>
    %71 = vector.shape_cast %70 : vector<1x4x1xf32> to vector<4x1xf32>
    %72 = vector.shape_cast %69 : vector<4x1xf32> to vector<1x4x1xf32>
    tpu.vector_store %arg17[%c1_43, %c0_44, %c0_45], %72 {strides = array<i32>} : memref<4x4x1xf32, #tpu.memory_space<vmem>>, vector<1x4x1xf32>,
    %cst_46 = arith.constant 0.000000e+00 : f32
    %73 = vector.broadcast %cst_46 : f32 to vector<4x128xf32>
    %74 = arith.select %32, %23, %73 : vector<4x128xi1>, vector<4x128xf32>
    %cst_47 = arith.constant 0xFF800000 : f32
    %75 = vector.broadcast %cst_47 : f32 to vector<4x128xf32>
    %76 = arith.select %32, %23, %75 : vector<4x128xi1>, vector<4x128xf32>
    %c2 = arith.constant 2 : index
    %c0_48 = arith.constant 0 : index
    %c0_49 = arith.constant 0 : index
    %77 = vector.load %arg16[%c2, %c0_48, %c0_49] : memref<4x4x1xf32, #tpu.memory_space<vmem>>, vector<1x4x1xf32>
    %78 = vector.shape_cast %77 : vector<1x4x1xf32> to vector<4x1xf32>
    %cst_50 = arith.constant dense<0.000000e+00> : vector<4xf32>
    %79 = vector.multi_reduction <add>, %74, %cst_50 [1] : vector<4x128xf32> to vector<4xf32>
    %80 = vector.shape_cast %79 : vector<4xf32> to vector<4x1xf32>
    %81 = arith.addf %78, %80 : vector<4x1xf32>
    %c2_51 = arith.constant 2 : index
    %c0_52 = arith.constant 0 : index
    %c0_53 = arith.constant 0 : index
    %82 = vector.load %arg16[%c2_51, %c0_52, %c0_53] : memref<4x4x1xf32, #tpu.memory_space<vmem>>, vector<1x4x1xf32>
    %83 = vector.shape_cast %82 : vector<1x4x1xf32> to vector<4x1xf32>
    %84 = vector.shape_cast %81 : vector<4x1xf32> to vector<1x4x1xf32>
    tpu.vector_store %arg16[%c2_51, %c0_52, %c0_53], %84 {strides = array<i32>} : memref<4x4x1xf32, #tpu.memory_space<vmem>>, vector<1x4x1xf32>,
    %c2_54 = arith.constant 2 : index
    %c0_55 = arith.constant 0 : index
    %c0_56 = arith.constant 0 : index
    %85 = vector.load %arg17[%c2_54, %c0_55, %c0_56] : memref<4x4x1xf32, #tpu.memory_space<vmem>>, vector<1x4x1xf32>
    %86 = vector.shape_cast %85 : vector<1x4x1xf32> to vector<4x1xf32>
    %cst_57 = arith.constant dense<0xFF800000> : vector<4xf32>
    %87 = vector.multi_reduction <maximumf>, %76, %cst_57 [1] : vector<4x128xf32> to vector<4xf32>
    %88 = vector.shape_cast %87 : vector<4xf32> to vector<4x1xf32>
    %89 = arith.maximumf %86, %88 : vector<4x1xf32>
    %c2_58 = arith.constant 2 : index
    %c0_59 = arith.constant 0 : index
    %c0_60 = arith.constant 0 : index
    %90 = vector.load %arg17[%c2_58, %c0_59, %c0_60] : memref<4x4x1xf32, #tpu.memory_space<vmem>>, vector<1x4x1xf32>
    %91 = vector.shape_cast %90 : vector<1x4x1xf32> to vector<4x1xf32>
    %92 = vector.shape_cast %89 : vector<4x1xf32> to vector<1x4x1xf32>
    tpu.vector_store %arg17[%c2_58, %c0_59, %c0_60], %92 {strides = array<i32>} : memref<4x4x1xf32, #tpu.memory_space<vmem>>, vector<1x4x1xf32>,
    %cst_61 = arith.constant 0.000000e+00 : f32
    %93 = vector.broadcast %cst_61 : f32 to vector<4x128xf32>
    %94 = arith.select %32, %26, %93 : vector<4x128xi1>, vector<4x128xf32>
    %cst_62 = arith.constant 0xFF800000 : f32
    %95 = vector.broadcast %cst_62 : f32 to vector<4x128xf32>
    %96 = arith.select %32, %26, %95 : vector<4x128xi1>, vector<4x128xf32>
    %c3 = arith.constant 3 : index
    %c0_63 = arith.constant 0 : index
    %c0_64 = arith.constant 0 : index
    %97 = vector.load %arg16[%c3, %c0_63, %c0_64] : memref<4x4x1xf32, #tpu.memory_space<vmem>>, vector<1x4x1xf32>
    %98 = vector.shape_cast %97 : vector<1x4x1xf32> to vector<4x1xf32>
    %cst_65 = arith.constant dense<0.000000e+00> : vector<4xf32>
    %99 = vector.multi_reduction <add>, %94, %cst_65 [1] : vector<4x128xf32> to vector<4xf32>
    %100 = vector.shape_cast %99 : vector<4xf32> to vector<4x1xf32>
    %101 = arith.addf %98, %100 : vector<4x1xf32>
    %c3_66 = arith.constant 3 : index
    %c0_67 = arith.constant 0 : index
    %c0_68 = arith.constant 0 : index
    %102 = vector.load %arg16[%c3_66, %c0_67, %c0_68] : memref<4x4x1xf32, #tpu.memory_space<vmem>>, vector<1x4x1xf32>
    %103 = vector.shape_cast %102 : vector<1x4x1xf32> to vector<4x1xf32>
    %104 = vector.shape_cast %101 : vector<4x1xf32> to vector<1x4x1xf32>
    tpu.vector_store %arg16[%c3_66, %c0_67, %c0_68], %104 {strides = array<i32>} : memref<4x4x1xf32, #tpu.memory_space<vmem>>, vector<1x4x1xf32>,
    %c3_69 = arith.constant 3 : index
    %c0_70 = arith.constant 0 : index
    %c0_71 = arith.constant 0 : index
    %105 = vector.load %arg17[%c3_69, %c0_70, %c0_71] : memref<4x4x1xf32, #tpu.memory_space<vmem>>, vector<1x4x1xf32>
    %106 = vector.shape_cast %105 : vector<1x4x1xf32> to vector<4x1xf32>
    %cst_72 = arith.constant dense<0xFF800000> : vector<4xf32>
    %107 = vector.multi_reduction <maximumf>, %96, %cst_72 [1] : vector<4x128xf32> to vector<4xf32>
    %108 = vector.shape_cast %107 : vector<4xf32> to vector<4x1xf32>
    %109 = arith.maximumf %106, %108 : vector<4x1xf32>
    %c3_73 = arith.constant 3 : index
    %c0_74 = arith.constant 0 : index
    %c0_75 = arith.constant 0 : index
    %110 = vector.load %arg17[%c3_73, %c0_74, %c0_75] : memref<4x4x1xf32, #tpu.memory_space<vmem>>, vector<1x4x1xf32>
    %111 = vector.shape_cast %110 : vector<1x4x1xf32> to vector<4x1xf32>
    %112 = vector.shape_cast %109 : vector<4x1xf32> to vector<1x4x1xf32>
    tpu.vector_store %arg17[%c3_73, %c0_74, %c0_75], %112 {strides = array<i32>} : memref<4x4x1xf32, #tpu.memory_space<vmem>>, vector<1x4x1xf32>,
    %c0_i32_76 = arith.constant 0 : i32
    %113 = arith.cmpi eq, %arg1, %c0_i32_76 : i32
    %114 = arith.extui %113 : i1 to i32
    %c0_i32_77 = arith.constant 0 : i32
    %115 = arith.cmpi ne, %114, %c0_i32_77 : i32
    scf.if %115 {
      %c0_78 = arith.constant 0 : index
      %c0_79 = arith.constant 0 : index
      %c0_80 = arith.constant 0 : index
      %116 = vector.load %arg16[%c0_78, %c0_79, %c0_80] : memref<4x4x1xf32, #tpu.memory_space<vmem>>, vector<1x4x1xf32>
      %117 = vector.shape_cast %116 : vector<1x4x1xf32> to vector<4x1xf32>
      %cst_81 = arith.constant 1.562500e-02 : f32
      %118 = vector.broadcast %cst_81 : f32 to vector<4x1xf32>
      %119 = arith.mulf %117, %118 : vector<4x1xf32>
      %c1_82 = arith.constant 1 : index
      %c0_83 = arith.constant 0 : index
      %c0_84 = arith.constant 0 : index
      %120 = vector.load %arg16[%c1_82, %c0_83, %c0_84] : memref<4x4x1xf32, #tpu.memory_space<vmem>>, vector<1x4x1xf32>
      %121 = vector.shape_cast %120 : vector<1x4x1xf32> to vector<4x1xf32>
      %cst_85 = arith.constant 1.562500e-02 : f32
      %122 = vector.broadcast %cst_85 : f32 to vector<4x1xf32>
      %123 = arith.mulf %121, %122 : vector<4x1xf32>
      %c2_86 = arith.constant 2 : index
      %c0_87 = arith.constant 0 : index
      %c0_88 = arith.constant 0 : index
      %124 = vector.load %arg16[%c2_86, %c0_87, %c0_88] : memref<4x4x1xf32, #tpu.memory_space<vmem>>, vector<1x4x1xf32>
      %125 = vector.shape_cast %124 : vector<1x4x1xf32> to vector<4x1xf32>
      %cst_89 = arith.constant 1.562500e-02 : f32
      %126 = vector.broadcast %cst_89 : f32 to vector<4x1xf32>
      %127 = arith.mulf %125, %126 : vector<4x1xf32>
      %c3_90 = arith.constant 3 : index
      %c0_91 = arith.constant 0 : index
      %c0_92 = arith.constant 0 : index
      %128 = vector.load %arg16[%c3_90, %c0_91, %c0_92] : memref<4x4x1xf32, #tpu.memory_space<vmem>>, vector<1x4x1xf32>
      %129 = vector.shape_cast %128 : vector<1x4x1xf32> to vector<4x1xf32>
      %cst_93 = arith.constant 1.562500e-02 : f32
      %130 = vector.broadcast %cst_93 : f32 to vector<4x1xf32>
      %131 = arith.mulf %129, %130 : vector<4x1xf32>
      %c0_94 = arith.constant 0 : index
      %c0_95 = arith.constant 0 : index
      %c0_96 = arith.constant 0 : index
      %132 = vector.load %arg17[%c0_94, %c0_95, %c0_96] : memref<4x4x1xf32, #tpu.memory_space<vmem>>, vector<1x4x1xf32>
      %133 = vector.shape_cast %132 : vector<1x4x1xf32> to vector<4x1xf32>
      %c1_97 = arith.constant 1 : index
      %c0_98 = arith.constant 0 : index
      %c0_99 = arith.constant 0 : index
      %134 = vector.load %arg17[%c1_97, %c0_98, %c0_99] : memref<4x4x1xf32, #tpu.memory_space<vmem>>, vector<1x4x1xf32>
      %135 = vector.shape_cast %134 : vector<1x4x1xf32> to vector<4x1xf32>
      %c2_100 = arith.constant 2 : index
      %c0_101 = arith.constant 0 : index
      %c0_102 = arith.constant 0 : index
      %136 = vector.load %arg17[%c2_100, %c0_101, %c0_102] : memref<4x4x1xf32, #tpu.memory_space<vmem>>, vector<1x4x1xf32>
      %137 = vector.shape_cast %136 : vector<1x4x1xf32> to vector<4x1xf32>
      %c3_103 = arith.constant 3 : index
      %c0_104 = arith.constant 0 : index
      %c0_105 = arith.constant 0 : index
      %138 = vector.load %arg17[%c3_103, %c0_104, %c0_105] : memref<4x4x1xf32, #tpu.memory_space<vmem>>, vector<1x4x1xf32>
      %139 = vector.shape_cast %138 : vector<1x4x1xf32> to vector<4x1xf32>
      %c0_106 = arith.constant 0 : index
      %c0_107 = arith.constant 0 : index
      %c0_108 = arith.constant 0 : index
      %140 = vector.load %arg7[%c0_106, %c0_107, %c0_108] : memref<2x1x1xf32, #tpu.memory_space<vmem>>, vector<1x1x1xf32>
      %141 = vector.shape_cast %140 : vector<1x1x1xf32> to vector<1x1xf32>
      %c0_109 = arith.constant 0 : index
      %c0_110 = arith.constant 0 : index
      %c0_111 = arith.constant 0 : index
      %c0_112 = arith.constant 0 : index
      %142 = vector.load %arg6[%c0_109, %c0_110, %c0_111, %c0_112] : memref<2x4x4x1xf32, #tpu.memory_space<vmem>>, vector<1x1x4x1xf32>
      %143 = vector.shape_cast %142 : vector<1x1x4x1xf32> to vector<4x1xf32>
      %144 = arith.mulf %143, %119 : vector<4x1xf32>
      %cst_113 = arith.constant dense<0.000000e+00> : vector<1xf32>
      %145 = vector.multi_reduction <add>, %144, %cst_113 [0] : vector<4x1xf32> to vector<1xf32>
      %146 = vector.shape_cast %145 : vector<1xf32> to vector<1x1xf32>
      %147 = arith.addf %141, %146 : vector<1x1xf32>
      %c0_114 = arith.constant 0 : index
      %c1_115 = arith.constant 1 : index
      %c0_116 = arith.constant 0 : index
      %c0_117 = arith.constant 0 : index
      %148 = vector.load %arg6[%c0_114, %c1_115, %c0_116, %c0_117] : memref<2x4x4x1xf32, #tpu.memory_space<vmem>>, vector<1x1x4x1xf32>
      %149 = vector.shape_cast %148 : vector<1x1x4x1xf32> to vector<4x1xf32>
      %150 = arith.mulf %149, %123 : vector<4x1xf32>
      %cst_118 = arith.constant dense<0.000000e+00> : vector<1xf32>
      %151 = vector.multi_reduction <add>, %150, %cst_118 [0] : vector<4x1xf32> to vector<1xf32>
      %152 = vector.shape_cast %151 : vector<1xf32> to vector<1x1xf32>
      %153 = arith.addf %147, %152 : vector<1x1xf32>
      %c0_119 = arith.constant 0 : index
      %c2_120 = arith.constant 2 : index
      %c0_121 = arith.constant 0 : index
      %c0_122 = arith.constant 0 : index
      %154 = vector.load %arg6[%c0_119, %c2_120, %c0_121, %c0_122] : memref<2x4x4x1xf32, #tpu.memory_space<vmem>>, vector<1x1x4x1xf32>
      %155 = vector.shape_cast %154 : vector<1x1x4x1xf32> to vector<4x1xf32>
      %156 = arith.mulf %155, %127 : vector<4x1xf32>
      %cst_123 = arith.constant dense<0.000000e+00> : vector<1xf32>
      %157 = vector.multi_reduction <add>, %156, %cst_123 [0] : vector<4x1xf32> to vector<1xf32>
      %158 = vector.shape_cast %157 : vector<1xf32> to vector<1x1xf32>
      %159 = arith.addf %153, %158 : vector<1x1xf32>
      %c0_124 = arith.constant 0 : index
      %c3_125 = arith.constant 3 : index
      %c0_126 = arith.constant 0 : index
      %c0_127 = arith.constant 0 : index
      %160 = vector.load %arg6[%c0_124, %c3_125, %c0_126, %c0_127] : memref<2x4x4x1xf32, #tpu.memory_space<vmem>>, vector<1x1x4x1xf32>
      %161 = vector.shape_cast %160 : vector<1x1x4x1xf32> to vector<4x1xf32>
      %162 = arith.mulf %161, %131 : vector<4x1xf32>
      %cst_128 = arith.constant dense<0.000000e+00> : vector<1xf32>
      %163 = vector.multi_reduction <add>, %162, %cst_128 [0] : vector<4x1xf32> to vector<1xf32>
      %164 = vector.shape_cast %163 : vector<1xf32> to vector<1x1xf32>
      %165 = arith.addf %159, %164 : vector<1x1xf32>
      %cst_129 = arith.constant 0.000000e+00 : f32
      %166 = vector.broadcast %cst_129 : f32 to vector<1x1xf32>
      %167 = arith.maximumf %165, %166 : vector<1x1xf32>
      %c0_130 = arith.constant 0 : index
      %c0_131 = arith.constant 0 : index
      %c0_132 = arith.constant 0 : index
      %168 = vector.load %arg8[%c0_130, %c0_131, %c0_132] : memref<2x4x1xf32, #tpu.memory_space<vmem>>, vector<1x4x1xf32>
      %169 = vector.shape_cast %168 : vector<1x4x1xf32> to vector<4x1xf32>
      %170 = vector.broadcast %167 : vector<1x1xf32> to vector<4x1xf32>
      %171 = arith.mulf %169, %170 : vector<4x1xf32>
      %cst_133 = arith.constant dense<0.000000e+00> : vector<4xf32>
      %172 = vector.multi_reduction <add>, %171, %cst_133 [1] : vector<4x1xf32> to vector<4xf32>
      %173 = vector.shape_cast %172 : vector<4xf32> to vector<4x1xf32>
      %c0_134 = arith.constant 0 : index
      %c0_135 = arith.constant 0 : index
      %c0_136 = arith.constant 0 : index
      %174 = vector.load %arg9[%c0_134, %c0_135, %c0_136] : memref<2x4x1xf32, #tpu.memory_space<vmem>>, vector<1x4x1xf32>
      %175 = vector.shape_cast %174 : vector<1x4x1xf32> to vector<4x1xf32>
      %176 = arith.addf %173, %175 : vector<4x1xf32>
      %cst_137 = arith.constant 0.000000e+00 : f32
      %177 = vector.broadcast %cst_137 : f32 to vector<4x1xf32>
      %178 = arith.subf %177, %176 : vector<4x1xf32>
      %179 = math.exp %178 : vector<4x1xf32>
      %cst_138 = arith.constant 1.000000e+00 : f32
      %180 = vector.broadcast %cst_138 : f32 to vector<4x1xf32>
      %181 = arith.addf %180, %179 : vector<4x1xf32>
      %182 = tpu.reciprocal %181 : vector<4x1xf32> -> vector<4x1xf32>
      %c1_139 = arith.constant 1 : index
      %c0_140 = arith.constant 0 : index
      %c0_141 = arith.constant 0 : index
      %183 = vector.load %arg7[%c1_139, %c0_140, %c0_141] : memref<2x1x1xf32, #tpu.memory_space<vmem>>, vector<1x1x1xf32>
      %184 = vector.shape_cast %183 : vector<1x1x1xf32> to vector<1x1xf32>
      %c1_142 = arith.constant 1 : index
      %c0_143 = arith.constant 0 : index
      %c0_144 = arith.constant 0 : index
      %c0_145 = arith.constant 0 : index
      %185 = vector.load %arg6[%c1_142, %c0_143, %c0_144, %c0_145] : memref<2x4x4x1xf32, #tpu.memory_space<vmem>>, vector<1x1x4x1xf32>
      %186 = vector.shape_cast %185 : vector<1x1x4x1xf32> to vector<4x1xf32>
      %187 = arith.mulf %186, %133 : vector<4x1xf32>
      %cst_146 = arith.constant dense<0.000000e+00> : vector<1xf32>
      %188 = vector.multi_reduction <add>, %187, %cst_146 [0] : vector<4x1xf32> to vector<1xf32>
      %189 = vector.shape_cast %188 : vector<1xf32> to vector<1x1xf32>
      %190 = arith.addf %184, %189 : vector<1x1xf32>
      %c1_147 = arith.constant 1 : index
      %c1_148 = arith.constant 1 : index
      %c0_149 = arith.constant 0 : index
      %c0_150 = arith.constant 0 : index
      %191 = vector.load %arg6[%c1_147, %c1_148, %c0_149, %c0_150] : memref<2x4x4x1xf32, #tpu.memory_space<vmem>>, vector<1x1x4x1xf32>
      %192 = vector.shape_cast %191 : vector<1x1x4x1xf32> to vector<4x1xf32>
      %193 = arith.mulf %192, %135 : vector<4x1xf32>
      %cst_151 = arith.constant dense<0.000000e+00> : vector<1xf32>
      %194 = vector.multi_reduction <add>, %193, %cst_151 [0] : vector<4x1xf32> to vector<1xf32>
      %195 = vector.shape_cast %194 : vector<1xf32> to vector<1x1xf32>
      %196 = arith.addf %190, %195 : vector<1x1xf32>
      %c1_152 = arith.constant 1 : index
      %c2_153 = arith.constant 2 : index
      %c0_154 = arith.constant 0 : index
      %c0_155 = arith.constant 0 : index
      %197 = vector.load %arg6[%c1_152, %c2_153, %c0_154, %c0_155] : memref<2x4x4x1xf32, #tpu.memory_space<vmem>>, vector<1x1x4x1xf32>
      %198 = vector.shape_cast %197 : vector<1x1x4x1xf32> to vector<4x1xf32>
      %199 = arith.mulf %198, %137 : vector<4x1xf32>
      %cst_156 = arith.constant dense<0.000000e+00> : vector<1xf32>
      %200 = vector.multi_reduction <add>, %199, %cst_156 [0] : vector<4x1xf32> to vector<1xf32>
      %201 = vector.shape_cast %200 : vector<1xf32> to vector<1x1xf32>
      %202 = arith.addf %196, %201 : vector<1x1xf32>
      %c1_157 = arith.constant 1 : index
      %c3_158 = arith.constant 3 : index
      %c0_159 = arith.constant 0 : index
      %c0_160 = arith.constant 0 : index
      %203 = vector.load %arg6[%c1_157, %c3_158, %c0_159, %c0_160] : memref<2x4x4x1xf32, #tpu.memory_space<vmem>>, vector<1x1x4x1xf32>
      %204 = vector.shape_cast %203 : vector<1x1x4x1xf32> to vector<4x1xf32>
      %205 = arith.mulf %204, %139 : vector<4x1xf32>
      %cst_161 = arith.constant dense<0.000000e+00> : vector<1xf32>
      %206 = vector.multi_reduction <add>, %205, %cst_161 [0] : vector<4x1xf32> to vector<1xf32>
      %207 = vector.shape_cast %206 : vector<1xf32> to vector<1x1xf32>
      %208 = arith.addf %202, %207 : vector<1x1xf32>
      %cst_162 = arith.constant 0.000000e+00 : f32
      %209 = vector.broadcast %cst_162 : f32 to vector<1x1xf32>
      %210 = arith.maximumf %208, %209 : vector<1x1xf32>
      %c1_163 = arith.constant 1 : index
      %c0_164 = arith.constant 0 : index
      %c0_165 = arith.constant 0 : index
      %211 = vector.load %arg8[%c1_163, %c0_164, %c0_165] : memref<2x4x1xf32, #tpu.memory_space<vmem>>, vector<1x4x1xf32>
      %212 = vector.shape_cast %211 : vector<1x4x1xf32> to vector<4x1xf32>
      %213 = vector.broadcast %210 : vector<1x1xf32> to vector<4x1xf32>
      %214 = arith.mulf %212, %213 : vector<4x1xf32>
      %cst_166 = arith.constant dense<0.000000e+00> : vector<4xf32>
      %215 = vector.multi_reduction <add>, %214, %cst_166 [1] : vector<4x1xf32> to vector<4xf32>
      %216 = vector.shape_cast %215 : vector<4xf32> to vector<4x1xf32>
      %c1_167 = arith.constant 1 : index
      %c0_168 = arith.constant 0 : index
      %c0_169 = arith.constant 0 : index
      %217 = vector.load %arg9[%c1_167, %c0_168, %c0_169] : memref<2x4x1xf32, #tpu.memory_space<vmem>>, vector<1x4x1xf32>
      %218 = vector.shape_cast %217 : vector<1x4x1xf32> to vector<4x1xf32>
      %219 = arith.addf %216, %218 : vector<4x1xf32>
      %cst_170 = arith.constant 0.000000e+00 : f32
      %220 = vector.broadcast %cst_170 : f32 to vector<4x1xf32>
      %221 = arith.subf %220, %219 : vector<4x1xf32>
      %222 = math.exp %221 : vector<4x1xf32>
      %cst_171 = arith.constant 1.000000e+00 : f32
      %223 = vector.broadcast %cst_171 : f32 to vector<4x1xf32>
      %224 = arith.addf %223, %222 : vector<4x1xf32>
      %225 = tpu.reciprocal %224 : vector<4x1xf32> -> vector<4x1xf32>
      %226 = arith.addf %182, %225 : vector<4x1xf32>
      %227 = arith.mulf %119, %226 : vector<4x1xf32>
      %228 = arith.mulf %123, %226 : vector<4x1xf32>
      %229 = arith.mulf %127, %226 : vector<4x1xf32>
      %230 = arith.mulf %131, %226 : vector<4x1xf32>
      %231 = arith.mulf %133, %226 : vector<4x1xf32>
      %232 = arith.mulf %135, %226 : vector<4x1xf32>
      %233 = arith.mulf %137, %226 : vector<4x1xf32>
      %234 = arith.mulf %139, %226 : vector<4x1xf32>
      %c0_172 = arith.constant 0 : index
      %c0_173 = arith.constant 0 : index
      %c0_174 = arith.constant 0 : index
      %235 = vector.load %arg11[%c0_172, %c0_173, %c0_174] : memref<2x1x1xf32, #tpu.memory_space<vmem>>, vector<1x1x1xf32>
      %236 = vector.shape_cast %235 : vector<1x1x1xf32> to vector<1x1xf32>
      %c0_175 = arith.constant 0 : index
      %c0_176 = arith.constant 0 : index
      %c0_177 = arith.constant 0 : index
      %c0_178 = arith.constant 0 : index
      %237 = vector.load %arg10[%c0_175, %c0_176, %c0_177, %c0_178] : memref<2x4x4x1xf32, #tpu.memory_space<vmem>>, vector<1x1x4x1xf32>
      %238 = vector.shape_cast %237 : vector<1x1x4x1xf32> to vector<4x1xf32>
      %239 = arith.mulf %238, %227 : vector<4x1xf32>
      %cst_179 = arith.constant dense<0.000000e+00> : vector<1xf32>
      %240 = vector.multi_reduction <add>, %239, %cst_179 [0] : vector<4x1xf32> to vector<1xf32>
      %241 = vector.shape_cast %240 : vector<1xf32> to vector<1x1xf32>
      %242 = arith.addf %236, %241 : vector<1x1xf32>
      %c0_180 = arith.constant 0 : index
      %c1_181 = arith.constant 1 : index
      %c0_182 = arith.constant 0 : index
      %c0_183 = arith.constant 0 : index
      %243 = vector.load %arg10[%c0_180, %c1_181, %c0_182, %c0_183] : memref<2x4x4x1xf32, #tpu.memory_space<vmem>>, vector<1x1x4x1xf32>
      %244 = vector.shape_cast %243 : vector<1x1x4x1xf32> to vector<4x1xf32>
      %245 = arith.mulf %244, %228 : vector<4x1xf32>
      %cst_184 = arith.constant dense<0.000000e+00> : vector<1xf32>
      %246 = vector.multi_reduction <add>, %245, %cst_184 [0] : vector<4x1xf32> to vector<1xf32>
      %247 = vector.shape_cast %246 : vector<1xf32> to vector<1x1xf32>
      %248 = arith.addf %242, %247 : vector<1x1xf32>
      %c0_185 = arith.constant 0 : index
      %c2_186 = arith.constant 2 : index
      %c0_187 = arith.constant 0 : index
      %c0_188 = arith.constant 0 : index
      %249 = vector.load %arg10[%c0_185, %c2_186, %c0_187, %c0_188] : memref<2x4x4x1xf32, #tpu.memory_space<vmem>>, vector<1x1x4x1xf32>
      %250 = vector.shape_cast %249 : vector<1x1x4x1xf32> to vector<4x1xf32>
      %251 = arith.mulf %250, %229 : vector<4x1xf32>
      %cst_189 = arith.constant dense<0.000000e+00> : vector<1xf32>
      %252 = vector.multi_reduction <add>, %251, %cst_189 [0] : vector<4x1xf32> to vector<1xf32>
      %253 = vector.shape_cast %252 : vector<1xf32> to vector<1x1xf32>
      %254 = arith.addf %248, %253 : vector<1x1xf32>
      %c0_190 = arith.constant 0 : index
      %c3_191 = arith.constant 3 : index
      %c0_192 = arith.constant 0 : index
      %c0_193 = arith.constant 0 : index
      %255 = vector.load %arg10[%c0_190, %c3_191, %c0_192, %c0_193] : memref<2x4x4x1xf32, #tpu.memory_space<vmem>>, vector<1x1x4x1xf32>
      %256 = vector.shape_cast %255 : vector<1x1x4x1xf32> to vector<4x1xf32>
      %257 = arith.mulf %256, %230 : vector<4x1xf32>
      %cst_194 = arith.constant dense<0.000000e+00> : vector<1xf32>
      %258 = vector.multi_reduction <add>, %257, %cst_194 [0] : vector<4x1xf32> to vector<1xf32>
      %259 = vector.shape_cast %258 : vector<1xf32> to vector<1x1xf32>
      %260 = arith.addf %254, %259 : vector<1x1xf32>
      %cst_195 = arith.constant 0.000000e+00 : f32
      %261 = vector.broadcast %cst_195 : f32 to vector<1x1xf32>
      %262 = arith.maximumf %260, %261 : vector<1x1xf32>
      %c0_196 = arith.constant 0 : index
      %c0_197 = arith.constant 0 : index
      %c0_198 = arith.constant 0 : index
      %c0_199 = arith.constant 0 : index
      %263 = vector.load %arg12[%c0_196, %c0_197, %c0_198, %c0_199] : memref<2x4x4x1xf32, #tpu.memory_space<vmem>>, vector<1x1x4x1xf32>
      %264 = vector.shape_cast %263 : vector<1x1x4x1xf32> to vector<4x1xf32>
      %265 = vector.broadcast %262 : vector<1x1xf32> to vector<4x1xf32>
      %266 = arith.mulf %264, %265 : vector<4x1xf32>
      %cst_200 = arith.constant dense<0.000000e+00> : vector<4xf32>
      %267 = vector.multi_reduction <add>, %266, %cst_200 [1] : vector<4x1xf32> to vector<4xf32>
      %268 = vector.shape_cast %267 : vector<4xf32> to vector<4x1xf32>
      %c0_201 = arith.constant 0 : index
      %c0_202 = arith.constant 0 : index
      %c0_203 = arith.constant 0 : index
      %c0_204 = arith.constant 0 : index
      %269 = vector.load %arg13[%c0_201, %c0_202, %c0_203, %c0_204] : memref<2x4x4x1xf32, #tpu.memory_space<vmem>>, vector<1x1x4x1xf32>
      %270 = vector.shape_cast %269 : vector<1x1x4x1xf32> to vector<4x1xf32>
      %271 = arith.addf %268, %270 : vector<4x1xf32>
      %cst_205 = arith.constant 0.000000e+00 : f32
      %272 = vector.broadcast %cst_205 : f32 to vector<4x1xf32>
      %273 = arith.subf %272, %271 : vector<4x1xf32>
      %274 = math.exp %273 : vector<4x1xf32>
      %cst_206 = arith.constant 1.000000e+00 : f32
      %275 = vector.broadcast %cst_206 : f32 to vector<4x1xf32>
      %276 = arith.addf %275, %274 : vector<4x1xf32>
      %277 = tpu.reciprocal %276 : vector<4x1xf32> -> vector<4x1xf32>
      %c0_207 = arith.constant 0 : index
      %c1_208 = arith.constant 1 : index
      %c0_209 = arith.constant 0 : index
      %c0_210 = arith.constant 0 : index
      %278 = vector.load %arg12[%c0_207, %c1_208, %c0_209, %c0_210] : memref<2x4x4x1xf32, #tpu.memory_space<vmem>>, vector<1x1x4x1xf32>
      %279 = vector.shape_cast %278 : vector<1x1x4x1xf32> to vector<4x1xf32>
      %280 = vector.broadcast %262 : vector<1x1xf32> to vector<4x1xf32>
      %281 = arith.mulf %279, %280 : vector<4x1xf32>
      %cst_211 = arith.constant dense<0.000000e+00> : vector<4xf32>
      %282 = vector.multi_reduction <add>, %281, %cst_211 [1] : vector<4x1xf32> to vector<4xf32>
      %283 = vector.shape_cast %282 : vector<4xf32> to vector<4x1xf32>
      %c0_212 = arith.constant 0 : index
      %c1_213 = arith.constant 1 : index
      %c0_214 = arith.constant 0 : index
      %c0_215 = arith.constant 0 : index
      %284 = vector.load %arg13[%c0_212, %c1_213, %c0_214, %c0_215] : memref<2x4x4x1xf32, #tpu.memory_space<vmem>>, vector<1x1x4x1xf32>
      %285 = vector.shape_cast %284 : vector<1x1x4x1xf32> to vector<4x1xf32>
      %286 = arith.addf %283, %285 : vector<4x1xf32>
      %cst_216 = arith.constant 0.000000e+00 : f32
      %287 = vector.broadcast %cst_216 : f32 to vector<4x1xf32>
      %288 = arith.subf %287, %286 : vector<4x1xf32>
      %289 = math.exp %288 : vector<4x1xf32>
      %cst_217 = arith.constant 1.000000e+00 : f32
      %290 = vector.broadcast %cst_217 : f32 to vector<4x1xf32>
      %291 = arith.addf %290, %289 : vector<4x1xf32>
      %292 = tpu.reciprocal %291 : vector<4x1xf32> -> vector<4x1xf32>
      %c0_218 = arith.constant 0 : index
      %c2_219 = arith.constant 2 : index
      %c0_220 = arith.constant 0 : index
      %c0_221 = arith.constant 0 : index
      %293 = vector.load %arg12[%c0_218, %c2_219, %c0_220, %c0_221] : memref<2x4x4x1xf32, #tpu.memory_space<vmem>>, vector<1x1x4x1xf32>
      %294 = vector.shape_cast %293 : vector<1x1x4x1xf32> to vector<4x1xf32>
      %295 = vector.broadcast %262 : vector<1x1xf32> to vector<4x1xf32>
      %296 = arith.mulf %294, %295 : vector<4x1xf32>
      %cst_222 = arith.constant dense<0.000000e+00> : vector<4xf32>
      %297 = vector.multi_reduction <add>, %296, %cst_222 [1] : vector<4x1xf32> to vector<4xf32>
      %298 = vector.shape_cast %297 : vector<4xf32> to vector<4x1xf32>
      %c0_223 = arith.constant 0 : index
      %c2_224 = arith.constant 2 : index
      %c0_225 = arith.constant 0 : index
      %c0_226 = arith.constant 0 : index
      %299 = vector.load %arg13[%c0_223, %c2_224, %c0_225, %c0_226] : memref<2x4x4x1xf32, #tpu.memory_space<vmem>>, vector<1x1x4x1xf32>
      %300 = vector.shape_cast %299 : vector<1x1x4x1xf32> to vector<4x1xf32>
      %301 = arith.addf %298, %300 : vector<4x1xf32>
      %cst_227 = arith.constant 0.000000e+00 : f32
      %302 = vector.broadcast %cst_227 : f32 to vector<4x1xf32>
      %303 = arith.subf %302, %301 : vector<4x1xf32>
      %304 = math.exp %303 : vector<4x1xf32>
      %cst_228 = arith.constant 1.000000e+00 : f32
      %305 = vector.broadcast %cst_228 : f32 to vector<4x1xf32>
      %306 = arith.addf %305, %304 : vector<4x1xf32>
      %307 = tpu.reciprocal %306 : vector<4x1xf32> -> vector<4x1xf32>
      %c0_229 = arith.constant 0 : index
      %c3_230 = arith.constant 3 : index
      %c0_231 = arith.constant 0 : index
      %c0_232 = arith.constant 0 : index
      %308 = vector.load %arg12[%c0_229, %c3_230, %c0_231, %c0_232] : memref<2x4x4x1xf32, #tpu.memory_space<vmem>>, vector<1x1x4x1xf32>
      %309 = vector.shape_cast %308 : vector<1x1x4x1xf32> to vector<4x1xf32>
      %310 = vector.broadcast %262 : vector<1x1xf32> to vector<4x1xf32>
      %311 = arith.mulf %309, %310 : vector<4x1xf32>
      %cst_233 = arith.constant dense<0.000000e+00> : vector<4xf32>
      %312 = vector.multi_reduction <add>, %311, %cst_233 [1] : vector<4x1xf32> to vector<4xf32>
      %313 = vector.shape_cast %312 : vector<4xf32> to vector<4x1xf32>
      %c0_234 = arith.constant 0 : index
      %c3_235 = arith.constant 3 : index
      %c0_236 = arith.constant 0 : index
      %c0_237 = arith.constant 0 : index
      %314 = vector.load %arg13[%c0_234, %c3_235, %c0_236, %c0_237] : memref<2x4x4x1xf32, #tpu.memory_space<vmem>>, vector<1x1x4x1xf32>
      %315 = vector.shape_cast %314 : vector<1x1x4x1xf32> to vector<4x1xf32>
      %316 = arith.addf %313, %315 : vector<4x1xf32>
      %cst_238 = arith.constant 0.000000e+00 : f32
      %317 = vector.broadcast %cst_238 : f32 to vector<4x1xf32>
      %318 = arith.subf %317, %316 : vector<4x1xf32>
      %319 = math.exp %318 : vector<4x1xf32>
      %cst_239 = arith.constant 1.000000e+00 : f32
      %320 = vector.broadcast %cst_239 : f32 to vector<4x1xf32>
      %321 = arith.addf %320, %319 : vector<4x1xf32>
      %322 = tpu.reciprocal %321 : vector<4x1xf32> -> vector<4x1xf32>
      %c1_240 = arith.constant 1 : index
      %c0_241 = arith.constant 0 : index
      %c0_242 = arith.constant 0 : index
      %323 = vector.load %arg11[%c1_240, %c0_241, %c0_242] : memref<2x1x1xf32, #tpu.memory_space<vmem>>, vector<1x1x1xf32>
      %324 = vector.shape_cast %323 : vector<1x1x1xf32> to vector<1x1xf32>
      %c1_243 = arith.constant 1 : index
      %c0_244 = arith.constant 0 : index
      %c0_245 = arith.constant 0 : index
      %c0_246 = arith.constant 0 : index
      %325 = vector.load %arg10[%c1_243, %c0_244, %c0_245, %c0_246] : memref<2x4x4x1xf32, #tpu.memory_space<vmem>>, vector<1x1x4x1xf32>
      %326 = vector.shape_cast %325 : vector<1x1x4x1xf32> to vector<4x1xf32>
      %327 = arith.mulf %326, %231 : vector<4x1xf32>
      %cst_247 = arith.constant dense<0.000000e+00> : vector<1xf32>
      %328 = vector.multi_reduction <add>, %327, %cst_247 [0] : vector<4x1xf32> to vector<1xf32>
      %329 = vector.shape_cast %328 : vector<1xf32> to vector<1x1xf32>
      %330 = arith.addf %324, %329 : vector<1x1xf32>
      %c1_248 = arith.constant 1 : index
      %c1_249 = arith.constant 1 : index
      %c0_250 = arith.constant 0 : index
      %c0_251 = arith.constant 0 : index
      %331 = vector.load %arg10[%c1_248, %c1_249, %c0_250, %c0_251] : memref<2x4x4x1xf32, #tpu.memory_space<vmem>>, vector<1x1x4x1xf32>
      %332 = vector.shape_cast %331 : vector<1x1x4x1xf32> to vector<4x1xf32>
      %333 = arith.mulf %332, %232 : vector<4x1xf32>
      %cst_252 = arith.constant dense<0.000000e+00> : vector<1xf32>
      %334 = vector.multi_reduction <add>, %333, %cst_252 [0] : vector<4x1xf32> to vector<1xf32>
      %335 = vector.shape_cast %334 : vector<1xf32> to vector<1x1xf32>
      %336 = arith.addf %330, %335 : vector<1x1xf32>
      %c1_253 = arith.constant 1 : index
      %c2_254 = arith.constant 2 : index
      %c0_255 = arith.constant 0 : index
      %c0_256 = arith.constant 0 : index
      %337 = vector.load %arg10[%c1_253, %c2_254, %c0_255, %c0_256] : memref<2x4x4x1xf32, #tpu.memory_space<vmem>>, vector<1x1x4x1xf32>
      %338 = vector.shape_cast %337 : vector<1x1x4x1xf32> to vector<4x1xf32>
      %339 = arith.mulf %338, %233 : vector<4x1xf32>
      %cst_257 = arith.constant dense<0.000000e+00> : vector<1xf32>
      %340 = vector.multi_reduction <add>, %339, %cst_257 [0] : vector<4x1xf32> to vector<1xf32>
      %341 = vector.shape_cast %340 : vector<1xf32> to vector<1x1xf32>
      %342 = arith.addf %336, %341 : vector<1x1xf32>
      %c1_258 = arith.constant 1 : index
      %c3_259 = arith.constant 3 : index
      %c0_260 = arith.constant 0 : index
      %c0_261 = arith.constant 0 : index
      %343 = vector.load %arg10[%c1_258, %c3_259, %c0_260, %c0_261] : memref<2x4x4x1xf32, #tpu.memory_space<vmem>>, vector<1x1x4x1xf32>
      %344 = vector.shape_cast %343 : vector<1x1x4x1xf32> to vector<4x1xf32>
      %345 = arith.mulf %344, %234 : vector<4x1xf32>
      %cst_262 = arith.constant dense<0.000000e+00> : vector<1xf32>
      %346 = vector.multi_reduction <add>, %345, %cst_262 [0] : vector<4x1xf32> to vector<1xf32>
      %347 = vector.shape_cast %346 : vector<1xf32> to vector<1x1xf32>
      %348 = arith.addf %342, %347 : vector<1x1xf32>
      %cst_263 = arith.constant 0.000000e+00 : f32
      %349 = vector.broadcast %cst_263 : f32 to vector<1x1xf32>
      %350 = arith.maximumf %348, %349 : vector<1x1xf32>
      %c1_264 = arith.constant 1 : index
      %c0_265 = arith.constant 0 : index
      %c0_266 = arith.constant 0 : index
      %c0_267 = arith.constant 0 : index
      %351 = vector.load %arg12[%c1_264, %c0_265, %c0_266, %c0_267] : memref<2x4x4x1xf32, #tpu.memory_space<vmem>>, vector<1x1x4x1xf32>
      %352 = vector.shape_cast %351 : vector<1x1x4x1xf32> to vector<4x1xf32>
      %353 = vector.broadcast %350 : vector<1x1xf32> to vector<4x1xf32>
      %354 = arith.mulf %352, %353 : vector<4x1xf32>
      %cst_268 = arith.constant dense<0.000000e+00> : vector<4xf32>
      %355 = vector.multi_reduction <add>, %354, %cst_268 [1] : vector<4x1xf32> to vector<4xf32>
      %356 = vector.shape_cast %355 : vector<4xf32> to vector<4x1xf32>
      %c1_269 = arith.constant 1 : index
      %c0_270 = arith.constant 0 : index
      %c0_271 = arith.constant 0 : index
      %c0_272 = arith.constant 0 : index
      %357 = vector.load %arg13[%c1_269, %c0_270, %c0_271, %c0_272] : memref<2x4x4x1xf32, #tpu.memory_space<vmem>>, vector<1x1x4x1xf32>
      %358 = vector.shape_cast %357 : vector<1x1x4x1xf32> to vector<4x1xf32>
      %359 = arith.addf %356, %358 : vector<4x1xf32>
      %cst_273 = arith.constant 0.000000e+00 : f32
      %360 = vector.broadcast %cst_273 : f32 to vector<4x1xf32>
      %361 = arith.subf %360, %359 : vector<4x1xf32>
      %362 = math.exp %361 : vector<4x1xf32>
      %cst_274 = arith.constant 1.000000e+00 : f32
      %363 = vector.broadcast %cst_274 : f32 to vector<4x1xf32>
      %364 = arith.addf %363, %362 : vector<4x1xf32>
      %365 = tpu.reciprocal %364 : vector<4x1xf32> -> vector<4x1xf32>
      %c1_275 = arith.constant 1 : index
      %c1_276 = arith.constant 1 : index
      %c0_277 = arith.constant 0 : index
      %c0_278 = arith.constant 0 : index
      %366 = vector.load %arg12[%c1_275, %c1_276, %c0_277, %c0_278] : memref<2x4x4x1xf32, #tpu.memory_space<vmem>>, vector<1x1x4x1xf32>
      %367 = vector.shape_cast %366 : vector<1x1x4x1xf32> to vector<4x1xf32>
      %368 = vector.broadcast %350 : vector<1x1xf32> to vector<4x1xf32>
      %369 = arith.mulf %367, %368 : vector<4x1xf32>
      %cst_279 = arith.constant dense<0.000000e+00> : vector<4xf32>
      %370 = vector.multi_reduction <add>, %369, %cst_279 [1] : vector<4x1xf32> to vector<4xf32>
      %371 = vector.shape_cast %370 : vector<4xf32> to vector<4x1xf32>
      %c1_280 = arith.constant 1 : index
      %c1_281 = arith.constant 1 : index
      %c0_282 = arith.constant 0 : index
      %c0_283 = arith.constant 0 : index
      %372 = vector.load %arg13[%c1_280, %c1_281, %c0_282, %c0_283] : memref<2x4x4x1xf32, #tpu.memory_space<vmem>>, vector<1x1x4x1xf32>
      %373 = vector.shape_cast %372 : vector<1x1x4x1xf32> to vector<4x1xf32>
      %374 = arith.addf %371, %373 : vector<4x1xf32>
      %cst_284 = arith.constant 0.000000e+00 : f32
      %375 = vector.broadcast %cst_284 : f32 to vector<4x1xf32>
      %376 = arith.subf %375, %374 : vector<4x1xf32>
      %377 = math.exp %376 : vector<4x1xf32>
      %cst_285 = arith.constant 1.000000e+00 : f32
      %378 = vector.broadcast %cst_285 : f32 to vector<4x1xf32>
      %379 = arith.addf %378, %377 : vector<4x1xf32>
      %380 = tpu.reciprocal %379 : vector<4x1xf32> -> vector<4x1xf32>
      %c1_286 = arith.constant 1 : index
      %c2_287 = arith.constant 2 : index
      %c0_288 = arith.constant 0 : index
      %c0_289 = arith.constant 0 : index
      %381 = vector.load %arg12[%c1_286, %c2_287, %c0_288, %c0_289] : memref<2x4x4x1xf32, #tpu.memory_space<vmem>>, vector<1x1x4x1xf32>
      %382 = vector.shape_cast %381 : vector<1x1x4x1xf32> to vector<4x1xf32>
      %383 = vector.broadcast %350 : vector<1x1xf32> to vector<4x1xf32>
      %384 = arith.mulf %382, %383 : vector<4x1xf32>
      %cst_290 = arith.constant dense<0.000000e+00> : vector<4xf32>
      %385 = vector.multi_reduction <add>, %384, %cst_290 [1] : vector<4x1xf32> to vector<4xf32>
      %386 = vector.shape_cast %385 : vector<4xf32> to vector<4x1xf32>
      %c1_291 = arith.constant 1 : index
      %c2_292 = arith.constant 2 : index
      %c0_293 = arith.constant 0 : index
      %c0_294 = arith.constant 0 : index
      %387 = vector.load %arg13[%c1_291, %c2_292, %c0_293, %c0_294] : memref<2x4x4x1xf32, #tpu.memory_space<vmem>>, vector<1x1x4x1xf32>
      %388 = vector.shape_cast %387 : vector<1x1x4x1xf32> to vector<4x1xf32>
      %389 = arith.addf %386, %388 : vector<4x1xf32>
      %cst_295 = arith.constant 0.000000e+00 : f32
      %390 = vector.broadcast %cst_295 : f32 to vector<4x1xf32>
      %391 = arith.subf %390, %389 : vector<4x1xf32>
      %392 = math.exp %391 : vector<4x1xf32>
      %cst_296 = arith.constant 1.000000e+00 : f32
      %393 = vector.broadcast %cst_296 : f32 to vector<4x1xf32>
      %394 = arith.addf %393, %392 : vector<4x1xf32>
      %395 = tpu.reciprocal %394 : vector<4x1xf32> -> vector<4x1xf32>
      %c1_297 = arith.constant 1 : index
      %c3_298 = arith.constant 3 : index
      %c0_299 = arith.constant 0 : index
      %c0_300 = arith.constant 0 : index
      %396 = vector.load %arg12[%c1_297, %c3_298, %c0_299, %c0_300] : memref<2x4x4x1xf32, #tpu.memory_space<vmem>>, vector<1x1x4x1xf32>
      %397 = vector.shape_cast %396 : vector<1x1x4x1xf32> to vector<4x1xf32>
      %398 = vector.broadcast %350 : vector<1x1xf32> to vector<4x1xf32>
      %399 = arith.mulf %397, %398 : vector<4x1xf32>
      %cst_301 = arith.constant dense<0.000000e+00> : vector<4xf32>
      %400 = vector.multi_reduction <add>, %399, %cst_301 [1] : vector<4x1xf32> to vector<4xf32>
      %401 = vector.shape_cast %400 : vector<4xf32> to vector<4x1xf32>
      %c1_302 = arith.constant 1 : index
      %c3_303 = arith.constant 3 : index
      %c0_304 = arith.constant 0 : index
      %c0_305 = arith.constant 0 : index
      %402 = vector.load %arg13[%c1_302, %c3_303, %c0_304, %c0_305] : memref<2x4x4x1xf32, #tpu.memory_space<vmem>>, vector<1x1x4x1xf32>
      %403 = vector.shape_cast %402 : vector<1x1x4x1xf32> to vector<4x1xf32>
      %404 = arith.addf %401, %403 : vector<4x1xf32>
      %cst_306 = arith.constant 0.000000e+00 : f32
      %405 = vector.broadcast %cst_306 : f32 to vector<4x1xf32>
      %406 = arith.subf %405, %404 : vector<4x1xf32>
      %407 = math.exp %406 : vector<4x1xf32>
      %cst_307 = arith.constant 1.000000e+00 : f32
      %408 = vector.broadcast %cst_307 : f32 to vector<4x1xf32>
      %409 = arith.addf %408, %407 : vector<4x1xf32>
      %410 = tpu.reciprocal %409 : vector<4x1xf32> -> vector<4x1xf32>
      %c0_308 = arith.constant 0 : index
      %c0_309 = arith.constant 0 : index
      %c0_310 = arith.constant 0 : index
      %411 = vector.load %arg14[%c0_308, %c0_309, %c0_310] : memref<1x4x1xf32, #tpu.memory_space<vmem>>, vector<1x4x1xf32>
      %412 = vector.shape_cast %411 : vector<1x4x1xf32> to vector<4x1xf32>
      %413 = vector.shape_cast %226 : vector<4x1xf32> to vector<1x4x1xf32>
      tpu.vector_store %arg14[%c0_308, %c0_309, %c0_310], %413 {strides = array<i32>} : memref<1x4x1xf32, #tpu.memory_space<vmem>>, vector<1x4x1xf32>,
      %414 = arith.addf %277, %365 : vector<4x1xf32>
      %415 = arith.mulf %226, %414 : vector<4x1xf32>
      %cst_311 = arith.constant 2.500000e-01 : f32
      %416 = vector.broadcast %cst_311 : f32 to vector<4x1xf32>
      %417 = arith.mulf %415, %416 : vector<4x1xf32>
      %c0_312 = arith.constant 0 : index
      %c0_313 = arith.constant 0 : index
      %c0_314 = arith.constant 0 : index
      %c0_315 = arith.constant 0 : index
      %418 = vector.load %arg15[%c0_312, %c0_313, %c0_314, %c0_315] : memref<1x4x4x1xf32, #tpu.memory_space<vmem>>, vector<1x1x4x1xf32>
      %419 = vector.shape_cast %418 : vector<1x1x4x1xf32> to vector<4x1xf32>
      %420 = vector.shape_cast %417 : vector<4x1xf32> to vector<1x1x4x1xf32>
      tpu.vector_store %arg15[%c0_312, %c0_313, %c0_314, %c0_315], %420 {strides = array<i32>} : memref<1x4x4x1xf32, #tpu.memory_space<vmem>>, vector<1x1x4x1xf32>,
      %421 = arith.addf %292, %380 : vector<4x1xf32>
      %422 = arith.mulf %226, %421 : vector<4x1xf32>
      %cst_316 = arith.constant 2.500000e-01 : f32
      %423 = vector.broadcast %cst_316 : f32 to vector<4x1xf32>
      %424 = arith.mulf %422, %423 : vector<4x1xf32>
      %c0_317 = arith.constant 0 : index
      %c1_318 = arith.constant 1 : index
      %c0_319 = arith.constant 0 : index
      %c0_320 = arith.constant 0 : index
      %425 = vector.load %arg15[%c0_317, %c1_318, %c0_319, %c0_320] : memref<1x4x4x1xf32, #tpu.memory_space<vmem>>, vector<1x1x4x1xf32>
      %426 = vector.shape_cast %425 : vector<1x1x4x1xf32> to vector<4x1xf32>
      %427 = vector.shape_cast %424 : vector<4x1xf32> to vector<1x1x4x1xf32>
      tpu.vector_store %arg15[%c0_317, %c1_318, %c0_319, %c0_320], %427 {strides = array<i32>} : memref<1x4x4x1xf32, #tpu.memory_space<vmem>>, vector<1x1x4x1xf32>,
      %428 = arith.addf %307, %395 : vector<4x1xf32>
      %429 = arith.mulf %226, %428 : vector<4x1xf32>
      %cst_321 = arith.constant 2.500000e-01 : f32
      %430 = vector.broadcast %cst_321 : f32 to vector<4x1xf32>
      %431 = arith.mulf %429, %430 : vector<4x1xf32>
      %c0_322 = arith.constant 0 : index
      %c2_323 = arith.constant 2 : index
      %c0_324 = arith.constant 0 : index
      %c0_325 = arith.constant 0 : index
      %432 = vector.load %arg15[%c0_322, %c2_323, %c0_324, %c0_325] : memref<1x4x4x1xf32, #tpu.memory_space<vmem>>, vector<1x1x4x1xf32>
      %433 = vector.shape_cast %432 : vector<1x1x4x1xf32> to vector<4x1xf32>
      %434 = vector.shape_cast %431 : vector<4x1xf32> to vector<1x1x4x1xf32>
      tpu.vector_store %arg15[%c0_322, %c2_323, %c0_324, %c0_325], %434 {strides = array<i32>} : memref<1x4x4x1xf32, #tpu.memory_space<vmem>>, vector<1x1x4x1xf32>,
      %435 = arith.addf %322, %410 : vector<4x1xf32>
      %436 = arith.mulf %226, %435 : vector<4x1xf32>
      %cst_326 = arith.constant 2.500000e-01 : f32
      %437 = vector.broadcast %cst_326 : f32 to vector<4x1xf32>
      %438 = arith.mulf %436, %437 : vector<4x1xf32>
      %c0_327 = arith.constant 0 : index
      %c3_328 = arith.constant 3 : index
      %c0_329 = arith.constant 0 : index
      %c0_330 = arith.constant 0 : index
      %439 = vector.load %arg15[%c0_327, %c3_328, %c0_329, %c0_330] : memref<1x4x4x1xf32, #tpu.memory_space<vmem>>, vector<1x1x4x1xf32>
      %440 = vector.shape_cast %439 : vector<1x1x4x1xf32> to vector<4x1xf32>
      %441 = vector.shape_cast %438 : vector<4x1xf32> to vector<1x1x4x1xf32>
      tpu.vector_store %arg15[%c0_327, %c3_328, %c0_329, %c0_330], %441 {strides = array<i32>} : memref<1x4x4x1xf32, #tpu.memory_space<vmem>>, vector<1x1x4x1xf32>,
    } else {
    }
    return
  }
  func.func @transform_0(%arg0: i32, %arg1: i32) -> (i32, i32, i32) {
    %c0_i32 = arith.constant 0 : i32
    %c0_i32_0 = arith.constant 0 : i32
    return %arg0, %c0_i32, %arg1 : i32, i32, i32
  }
  func.func @transform_1(%arg0: i32, %arg1: i32) -> (i32, i32, i32) {
    %c0_i32 = arith.constant 0 : i32
    %c0_i32_0 = arith.constant 0 : i32
    return %arg0, %c0_i32, %arg1 : i32, i32, i32
  }
  func.func @transform_2(%arg0: i32, %arg1: i32) -> (i32, i32, i32) {
    %c0_i32 = arith.constant 0 : i32
    %c0_i32_0 = arith.constant 0 : i32
    return %arg0, %c0_i32, %arg1 : i32, i32, i32
  }
  func.func @transform_3(%arg0: i32, %arg1: i32) -> (i32, i32, i32) {
    %c0_i32 = arith.constant 0 : i32
    %c0_i32_0 = arith.constant 0 : i32
    return %arg0, %c0_i32, %arg1 : i32, i32, i32
  }
  func.func @transform_4(%arg0: i32, %arg1: i32) -> (i32, i32, i32, i32) {
    %c0_i32 = arith.constant 0 : i32
    %c0_i32_0 = arith.constant 0 : i32
    %c0_i32_1 = arith.constant 0 : i32
    %c0_i32_2 = arith.constant 0 : i32
    %c0_i32_3 = arith.constant 0 : i32
    return %c0_i32, %c0_i32_0, %c0_i32_1, %c0_i32_2 : i32, i32, i32, i32
  }
  func.func @transform_5(%arg0: i32, %arg1: i32) -> (i32, i32, i32) {
    %c0_i32 = arith.constant 0 : i32
    %c0_i32_0 = arith.constant 0 : i32
    %c0_i32_1 = arith.constant 0 : i32
    %c0_i32_2 = arith.constant 0 : i32
    return %c0_i32, %c0_i32_0, %c0_i32_1 : i32, i32, i32
  }
  func.func @transform_6(%arg0: i32, %arg1: i32) -> (i32, i32, i32) {
    %c0_i32 = arith.constant 0 : i32
    %c0_i32_0 = arith.constant 0 : i32
    %c0_i32_1 = arith.constant 0 : i32
    %c0_i32_2 = arith.constant 0 : i32
    return %c0_i32, %c0_i32_0, %c0_i32_1 : i32, i32, i32
  }
  func.func @transform_7(%arg0: i32, %arg1: i32) -> (i32, i32, i32) {
    %c0_i32 = arith.constant 0 : i32
    %c0_i32_0 = arith.constant 0 : i32
    %c0_i32_1 = arith.constant 0 : i32
    %c0_i32_2 = arith.constant 0 : i32
    return %c0_i32, %c0_i32_0, %c0_i32_1 : i32, i32, i32
  }
  func.func @transform_8(%arg0: i32, %arg1: i32) -> (i32, i32, i32, i32) {
    %c0_i32 = arith.constant 0 : i32
    %c0_i32_0 = arith.constant 0 : i32
    %c0_i32_1 = arith.constant 0 : i32
    %c0_i32_2 = arith.constant 0 : i32
    %c0_i32_3 = arith.constant 0 : i32
    return %c0_i32, %c0_i32_0, %c0_i32_1, %c0_i32_2 : i32, i32, i32, i32
  }
  func.func @transform_9(%arg0: i32, %arg1: i32) -> (i32, i32, i32) {
    %c0_i32 = arith.constant 0 : i32
    %c0_i32_0 = arith.constant 0 : i32
    %c0_i32_1 = arith.constant 0 : i32
    %c0_i32_2 = arith.constant 0 : i32
    return %c0_i32, %c0_i32_0, %c0_i32_1 : i32, i32, i32
  }
  func.func @transform_10(%arg0: i32, %arg1: i32) -> (i32, i32, i32, i32) {
    %c0_i32 = arith.constant 0 : i32
    %c0_i32_0 = arith.constant 0 : i32
    %c0_i32_1 = arith.constant 0 : i32
    %c0_i32_2 = arith.constant 0 : i32
    %c0_i32_3 = arith.constant 0 : i32
    return %c0_i32, %c0_i32_0, %c0_i32_1, %c0_i32_2 : i32, i32, i32, i32
  }
  func.func @transform_11(%arg0: i32, %arg1: i32) -> (i32, i32, i32, i32) {
    %c0_i32 = arith.constant 0 : i32
    %c0_i32_0 = arith.constant 0 : i32
    %c0_i32_1 = arith.constant 0 : i32
    %c0_i32_2 = arith.constant 0 : i32
    %c0_i32_3 = arith.constant 0 : i32
    return %c0_i32, %c0_i32_0, %c0_i32_1, %c0_i32_2 : i32, i32, i32, i32
  }
  func.func @transform_12(%arg0: i32, %arg1: i32) -> (i32, i32, i32) {
    %c0_i32 = arith.constant 0 : i32
    %c0_i32_0 = arith.constant 0 : i32
    %c0_i32_1 = arith.constant 0 : i32
    return %arg0, %c0_i32, %c0_i32_0 : i32, i32, i32
  }
  func.func @transform_13(%arg0: i32, %arg1: i32) -> (i32, i32, i32, i32) {
    %c0_i32 = arith.constant 0 : i32
    %c0_i32_0 = arith.constant 0 : i32
    %c0_i32_1 = arith.constant 0 : i32
    %c0_i32_2 = arith.constant 0 : i32
    return %arg0, %c0_i32, %c0_i32_0, %c0_i32_1 : i32, i32, i32, i32
  }
}

</mosaic_0001>

<bundles_post_ra>
// kernel: wgb_wowa_forward.3
= control target key start
LH: loop header
LB: loop body
LE: loop exit
PB: predicated region body
PF: predicated region fallthrough
CT: control target
= control target key end

     0   :  { %s1030_s30 = smov 0   ;;  %s1032_s10 = smov 0   ;;  %s1098_s0 = inlined_call_operand.vmem [shape: f32[2,4,128], index: 0, kind: input, shape index: {}]   ;;  %s1099_s1 = inlined_call_operand.vmem [shape: f32[2,4,128], index: 1, kind: input, shape index: {}]   ;;  %s1100_s2 = inlined_call_operand.vmem [shape: f32[2,4,128], index: 2, kind: input, shape index: {}]   ;;  %s1101_s3 = inlined_call_operand.vmem [shape: f32[2,4,128], index: 3, kind: input, shape index: {}]   ;;  %s1102_s4 = inlined_call_operand.vmem [shape: f32[2,4,1], index: 4, kind: input, shape index: {}]   ;;  %s1103_s5 = inlined_call_operand.vmem [shape: f32[2,4,4,1], index: 5, kind: input, shape index: {}]   ;;  %s1104_s6 = inlined_call_operand.vmem [shape: f32[2,4,128], index: 6, kind: output, shape index: {0}]   ;;  %s1105_s7 = inlined_call_operand.vmem [shape: f32[2,4,128], index: 7, kind: output, shape index: {1}]   ;;  %s1106_s8 = inlined_call_operand.vmem [shape: f32[2,4,128], index: 8, kind: output, shape index: {2}]   ;;  %s1107_s9 = inlined_call_operand.vmem [shape: f32[2,4,128], index: 9, kind: output, shape index: {3}]  }
   0x1   :  { %s1034_s11 = smov 0  }
   0x2 LB: > { %s32_s12 = sadd.s32 1, %s973_s10  ;;  %p894_p0 = scmp.ge.s32.totalorder %s977_s11, 1  ;;  %s977_s11 = sphi %s1034_s11, %s20_s11   ;;  %s973_s10 = sphi %s1032_s10, %s1109_s10   ;;  %s969_s30 = sphi %s1030_s30, %s1108_s30  }
   0x3   : > { %p34_p1 = scmp.ge.s32.totalorder %s32_s12, 2  ;;  %p379_p2 = scmp.lt.s32.totalorder %s977_s11, 3 }
   0x5   : > { %s1111_s12 = smov (%p34_p1, %s32_s12), 0  ;;  %p380_p3 = pnand %p894_p0, %p379_p2 }
   0x6   : > { %p470_p4 = scmp.lt.s32.totalorder (!%p380_p3), %s969_s30, 1  ;;  %v979_v0 = vmov (!%p380_p3), 0  }
   0x7   : > { %383 = sbr.rel (%p380_p3) target bundleno = 190 (0xbe), region = 44  ;;  %938 = vset.pattern.permute.xlu1 (!%p380_p3), %v979_v0  ;;  %937 = vset.pattern.permute.xlu0 (!%p380_p3), %v979_v0 }
   0xe   : > { %s1113_s30 = smov (!%p470_p4, %s969_s30), 1 }
   0xf   : > { %s911_s13 = sshll.u32 %s1113_s30, 4  ;;  %s1051_s17 = sshll.u32 %s1113_s30, 2 }
  0x10   : > { %s506_s16 = scalar_lea.vmem %s1103_s5, %s911_s13  ;;  %s501_s20 = scalar_lea.vmem %s1102_s4, %s1051_s17 }
  0x11   : > { %v907_v1 = vld [vmem:[%s506_s16 + $0x8] sm:$0xf]  ;;  %v545_v2 = vld [vmem:[%s506_s16] sm:$0xf]  ;;  %v908_v3 = vld [vmem:[%s506_s16 + $0xc] sm:$0xf]  ;;  %s476_s23 = scalar_lea.vmem %s1098_s0, %s1051_s17  ;;  %s483_s26 = scalar_lea.vmem %s1099_s1, %s1051_s17 }
  0x12   : > { %566 = vperm.xlu1 %938, %v907_v1   ;;  %548 = vperm.xlu0 %937, %v545_v2   ;;  %v906_v4 = vld [vmem:[%s506_s16 + $0x4] sm:$0xf]  ;;  %v539_v5 = vld [vmem:[%s501_s20] sm:$0xf]  ;;  %s490_s29 = scalar_lea.vmem %s1100_s2, %s1051_s17  ;;  %s497_s14 = scalar_lea.vmem %s1101_s3, %s1051_s17 }
  0x13   : > { %v535_v6 = vld [vmem:[%s476_s23] sm:$0xf]  ;;  %s513_s18 = scalar_lea.vmem %s1104_s6, %s1051_s17  ;;  %s520_s21 = scalar_lea.vmem %s1105_s7, %s1051_s17 }
  0x14   : > { %v536_v7 = vld [vmem:[%s483_s26] sm:$0xf]  ;;  %s527_s24 = scalar_lea.vmem %s1106_s8, %s1051_s17  ;;  %s534_s27 = scalar_lea.vmem %s1107_s9, %s1051_s17 }
  0x15   : > { %v537_v8 = vld [vmem:[%s490_s29] sm:$0xf]  ;;  %v542_v10 = vsub.f32 %v536_v7, %v535_v6  ;;  %v540_v12 = vadd.f32 %v536_v7, %v535_v6 }
  0x16   : > { %575 = vperm.xlu1 %938, %v908_v3   ;;  %557 = vperm.xlu0 %937, %v906_v4   ;;  %v538_v9 = vld [vmem:[%s497_s14] sm:$0xf] }
  0x17   : > { %v543_v11 = vsub.f32 %v538_v9, %v537_v8  ;;  %v541_v13 = vadd.f32 %v538_v9, %v537_v8 }
  0x19   : > { %v561_v16 = vadd.f32 %v543_v11, %v542_v10  ;;  %v544_v17 = vadd.f32 %v541_v13, %v540_v12  ;;  %v570_v18 = vsub.f32 %v543_v11, %v542_v10  ;;  %v552_v19 = vsub.f32 %v541_v13, %v540_v12 }
  0x1a   : > { %589 = vperm.xlu0 %937, %v539_v5  }
  0x91   : > { %v567_v14 = vpop.permute.xlu1 %566  ;;  %v549_v15 = vpop.permute.xlu0 %548 }
  0x92   : > { %v569_v22 = vmul.f32 %v567_v14, %v561_v16  ;;  %v551_v23 = vmul.f32 %v549_v15, %v544_v17 }
  0x95   : > { %v576_v20 = vpop.permute.xlu1 %575  ;;  %v558_v21 = vpop.permute.xlu0 %557 }
  0x96   : > { %v578_v24 = vmul.f32 %v576_v20, %v570_v18  ;;  %v560_v25 = vmul.f32 %v558_v21, %v552_v19 }
  0x98   : > { %v581_v26 = vsub.f32 %v578_v24, %v569_v22  ;;  %v582_v27 = vadd.f32 %v578_v24, %v569_v22  ;;  %v579_v28 = vsub.f32 %v551_v23, %v560_v25  ;;  %v580_v29 = vadd.f32 %v560_v25, %v551_v23 }
  0x99   : > { %v590_v50 = vpop.permute.xlu0 %589 }
  0x9a   : > { %v583_v30 = vadd.f32 %v581_v26, %v579_v28  ;;  %v584_v31 = vsub.f32 %v579_v28, %v581_v26  ;;  %v585_v32 = vsub.f32 %v580_v29, %v582_v27  ;;  %v586_v33 = vadd.f32 %v582_v27, %v580_v29 }
  0x9b   : > { %v592_v51 = vmul.f32 %v590_v50, %v535_v6  ;;  %v600_v53 = vmul.f32 %v590_v50, %v536_v7  ;;  %v608_v56 = vmul.f32 %v590_v50, %v537_v8  ;;  %v616_v59 = vmul.f32 %v590_v50, %v538_v9 }
  0x9c   : > { %v593_v34 = vsub.f32 0.0, %v583_v30  ;;  %v601_v35 = vsub.f32 0.0, %v584_v31  ;;  %v609_v36 = vsub.f32 0.0, %v585_v32  ;;  %v617_v37 = vsub.f32 0.0, %v586_v33 }
  0x9e   : > { %v594_v38 = vmul.f32 1.442695, %v593_v34  ;;  %v602_v39 = vmul.f32 1.442695, %v601_v35  ;;  %v610_v40 = vmul.f32 1.442695, %v609_v36 }
  0x9f   : > { %v618_v41 = vmul.f32 1.442695, %v617_v37 }
  0xa0   : > { %939 = vpow2.f32 %v594_v38 }
  0xa1   : > { %941 = vpow2.f32 %v602_v39 }
  0xa2   : > { %943 = vpow2.f32 %v610_v40 }
  0xa3   : > { %945 = vpow2.f32 %v618_v41 }
  0xaa   : > { %v940_v42 = vpop.eup %939 }
  0xab   : > { %v942_v43 = vpop.eup %941  ;;  %v596_v44 = vadd.f32 1.0, %v940_v42 }
  0xac   : > { %v944_v45 = vpop.eup %943  ;;  %v604_v46 = vadd.f32 1.0, %v942_v43 }
  0xad   : > { %v946_v47 = vpop.eup %945  ;;  %947 = vrcp.f32 %v596_v44  ;;  %v612_v48 = vadd.f32 1.0, %v944_v45 }
  0xae   : > { %949 = vrcp.f32 %v604_v46  ;;  %v620_v49 = vadd.f32 1.0, %v946_v47 }
  0xaf   : > { %951 = vrcp.f32 %v612_v48 }
  0xb0   : > { %953 = vrcp.f32 %v620_v49 }
  0xb7   : > { %v948_v52 = vpop.eup %947 }
  0xb8   : > { %v950_v54 = vpop.eup %949  ;;  %v598_v55 = vmul.f32 %v948_v52, %v592_v51 }
  0xb9   : > { %v952_v57 = vpop.eup %951  ;;  %v606_v58 = vmul.f32 %v950_v54, %v600_v53 }
  0xba   : > { %v954_v60 = vpop.eup %953  ;;  %599 = vst [vmem:[%s513_s18] sm:$0xf] %v598_v55  ;;  %v614_v61 = vmul.f32 %v952_v57, %v608_v56 }
  0xbb   : > { %607 = vst [vmem:[%s520_s21] sm:$0xf] %v606_v58  ;;  %v622_v62 = vmul.f32 %v954_v60, %v616_v59 }
  0xbc   : > { %615 = vst [vmem:[%s527_s24] sm:$0xf] %v614_v61 }
  0xbd   : > { %623 = vst [vmem:[%s534_s27] sm:$0xf] %v622_v62 }
  0xbe PF: > { %s20_s11 = sadd.s32 1, %s977_s11   ;;  %s1108_s30 = smov %s973_s10 }
  0xbf   : > { %p17_p5 = scmp.ge.s32.totalorder %s20_s11, 4   ;;  %s1109_s10 = smov %s1111_s12 }
  0xc1   :  { %19 = sbr.rel (!%p17_p5) target bundleno = 2 (0x2), region = 128 }

// kernel: wgb_wowa_forward.2
= control target key start
LH: loop header
LB: loop body
LE: loop exit
PB: predicated region body
PF: predicated region fallthrough
CT: control target
= control target key end

     0   :  { %s1377_s25 = smov 0   ;;  %s1379_s26 = smov 0   ;;  %s1661_s0 = inlined_call_operand.vmem [shape: f32[2,4,128], index: 0, kind: input, shape index: {}]   ;;  %s1662_s1 = inlined_call_operand.vmem [shape: f32[2,4,128], index: 1, kind: input, shape index: {}]   ;;  %s1663_s2 = inlined_call_operand.vmem [shape: f32[2,4,128], index: 2, kind: input, shape index: {}]   ;;  %s1664_s3 = inlined_call_operand.vmem [shape: f32[2,4,128], index: 3, kind: input, shape index: {}]   ;;  %s1665_s4 = inlined_call_operand.vmem [shape: f32[2,4,4,1], index: 4, kind: input, shape index: {}]   ;;  %s1666_s5 = inlined_call_operand.vmem [shape: f32[2,1,1], index: 5, kind: input, shape index: {}]   ;;  %s1667_s6 = inlined_call_operand.vmem [shape: f32[2,4,1], index: 6, kind: input, shape index: {}]   ;;  %s1668_s7 = inlined_call_operand.vmem [shape: f32[2,4,1], index: 7, kind: input, shape index: {}]   ;;  %s1669_s8 = inlined_call_operand.vmem [shape: f32[2,4,4,1], index: 8, kind: input, shape index: {}]   ;;  %s1670_s9 = inlined_call_operand.vmem [shape: f32[2,1,1], index: 9, kind: input, shape index: {}]   ;;  %s1671_s10 = inlined_call_operand.vmem [shape: f32[2,4,4,1], index: 10, kind: input, shape index: {}]   ;;  %s1672_s11 = inlined_call_operand.vmem [shape: f32[2,4,4,1], index: 11, kind: input, shape index: {}]   ;;  %s1673_s12 = inlined_call_operand.vmem [shape: f32[2,4,1], index: 12, kind: output, shape index: {0}]   ;;  %s1674_s13 = inlined_call_operand.vmem [shape: f32[2,4,4,1], index: 13, kind: output, shape index: {1}]  }
   0x1   :  { %s1381_s27 = smov 0  }
   0x2 LB: > { %s36_s28 = sadd.s32 1, %s1299_s26  ;;  %p1169_p0 = scmp.ge.s32.totalorder %s1303_s27, 1  ;;  %s1303_s27 = sphi %s1381_s27, %s24_s27   ;;  %s1299_s26 = sphi %s1379_s26, %s1676_s26   ;;  %s1295_s25 = sphi %s1377_s25, %s1675_s25  }
   0x3   : > { %p38_p1 = scmp.ge.s32.totalorder %s36_s28, 2  ;;  %p448_p2 = scmp.lt.s32.totalorder %s1303_s27, 3 }
   0x5   : > { %s1678_s28 = smov (%p38_p1, %s36_s28), 0  ;;  %p449_p3 = pnand %p1169_p0, %p448_p2 }
   0x6   : > { %p519_p4 = scmp.lt.s32.totalorder (!%p449_p3), %s1295_s25, 1  ;;  %vm560_vm0 = vcmask (!%p449_p3), 3072   ;;  %v1305_v0 = vmov (!%p449_p3), 0.0   ;;  %v585_v1 = vlaneseq (!%p449_p3)  ;;  %vm594_vm2 = vcmask (!%p449_p3), 1043456   ;;  %v1177_v52 = vld [vmem:[%s1665_s4 + $0x4] sm:$0xf] (!%p449_p3) }
   0x7   : > { %452 = sbr.rel (%p449_p3) target bundleno = 325 (0x145), region = 68  ;;  %562 = vst.msk [vmem:[#allocation2 + $0x4] sm:$0xf] (!%p449_p3), %vm560_vm0, %v1305_v0  ;;  %561 = vst.msk [vmem:[#allocation2] sm:$0xf] (!%p449_p3), %vm560_vm0, %v1305_v0  ;;  %v1306_v35 = vmov (!%p449_p3), -inf  }
   0x8   : > { %563 = vst.msk [vmem:[#allocation2 + $0x8] sm:$0xf] (!%p449_p3), %vm560_vm0, %v1305_v0  ;;  %564 = vst.msk [vmem:[#allocation2 + $0xc] sm:$0xf] (!%p449_p3), %vm560_vm0, %v1305_v0  ;;  %v586_v7 = vand.u32 (!%p449_p3), 127, %v585_v1 }
   0x9   : > { %566 = vst.msk [vmem:[#allocation3 + $0x4] sm:$0xf] (!%p449_p3), %vm560_vm0, %v1306_v35  ;;  %565 = vst.msk [vmem:[#allocation3] sm:$0xf] (!%p449_p3), %vm560_vm0, %v1306_v35  ;;  %v671_v53 = vld [vmem:[%s1665_s4] sm:$0xf] (!%p449_p3) }
   0xa   : > { %vm590_vm1 = vcmp.lt.s32.totalorder (!%p449_p3), %v586_v7, 64  ;;  %567 = vst.msk [vmem:[#allocation3 + $0x8] sm:$0xf] (!%p449_p3), %vm560_vm0, %v1306_v35  ;;  %568 = vst.msk [vmem:[#allocation3 + $0xc] sm:$0xf] (!%p449_p3), %vm560_vm0, %v1306_v35 }
   0xb   : > { %v1182_v62 = vld [vmem:[%s1665_s4 + $0x14] sm:$0xf] (!%p449_p3)  ;;  %v1181_v63 = vld [vmem:[%s1665_s4 + $0x10] sm:$0xf] (!%p449_p3) }
   0xe   : > { %s1680_s25 = smov (!%p519_p4, %s1295_s25), 1  ;;  %v610_v36 = vld [vmem:[#allocation2 + $0x4] sm:$0xf]  ;;  %v593_v37 = vld [vmem:[#allocation2] sm:$0xf] }
   0xf   : > { %s1402_s29 = sshll.u32 %s1680_s25, 2  ;;  %v626_v49 = vld [vmem:[#allocation2 + $0x8] sm:$0xf]  ;;  %v642_v59 = vld [vmem:[#allocation2 + $0xc] sm:$0xf] }
  0x10   : > { %s525_s15 = scalar_lea.vmem %s1661_s0, %s1402_s29  ;;  %s532_s18 = scalar_lea.vmem %s1662_s1, %s1402_s29  ;;  %v617_v42 = vld [vmem:[#allocation3 + $0x4] sm:$0xf]  ;;  %v601_v43 = vld [vmem:[#allocation3] sm:$0xf] }
  0x11   : > { %s539_s21 = scalar_lea.vmem %s1663_s2, %s1402_s29  ;;  %s546_s24 = scalar_lea.vmem %s1664_s3, %s1402_s29  ;;  %v569_v2 = vld [vmem:[%s525_s15] sm:$0xf]  ;;  %v633_v48 = vld [vmem:[#allocation3 + $0x8] sm:$0xf]  ;;  %v649_v56 = vld [vmem:[#allocation3 + $0xc] sm:$0xf] }
  0x12   : > { %v570_v3 = vld [vmem:[%s532_s18] sm:$0xf]  ;;  %s550_s19 = scalar_lea.vmem %s1673_s12, %s1402_s29 }
  0x13   : > { %v571_v4 = vld [vmem:[%s539_s21] sm:$0xf]  ;;  %v573_v6 = vadd.f32 %v570_v3, %v569_v2  ;;  %v575_v8 = vsub.f32 %v570_v3, %v569_v2  ;;  %s1214_s21 = sshll.u32 %s1680_s25, 4 }
  0x14   : > { %v572_v5 = vld [vmem:[%s546_s24] sm:$0xf] }
  0x15   : > { %v574_v9 = vadd.f32 %v572_v5, %v571_v4  ;;  %v576_v10 = vsub.f32 %v572_v5, %v571_v4 }
  0x17   : > { %v579_v11 = vsub.f32 %v574_v9, %v573_v6  ;;  %v577_v12 = vadd.f32 %v574_v9, %v573_v6  ;;  %v581_v13 = vadd.f32 %v576_v10, %v575_v8  ;;  %v583_v17 = vsub.f32 %v576_v10, %v575_v8 }
  0x19   : > { %v580_v14 = vmul.f32 0.5, %v579_v11  ;;  %v578_v15 = vmul.f32 0.5, %v577_v12  ;;  %v582_v16 = vmul.f32 0.5, %v581_v13  ;;  %v584_v28 = vmul.f32 0.5, %v583_v17 }
  0x1b   : > { %v607_v18 = vsel %vm590_vm1, %v580_v14, 0.0  ;;  %v591_v19 = vsel %vm590_vm1, %v578_v15, 0.0  ;;  %v608_v20 = vsel %vm590_vm1, %v580_v14, -inf  ;;  %v592_v21 = vsel %vm590_vm1, %v578_v15, -inf  ;;  %v1183_v15 = vld [vmem:[%s1665_s4 + $0x18] sm:$0xf] }
  0x1c   : > { %v611_v22 = vsel %vm594_vm2, %v607_v18, 0.0  ;;  %v595_v23 = vsel %vm594_vm2, %v591_v19, 0.0  ;;  %v618_v24 = vsel %vm594_vm2, %v608_v20, -inf  ;;  %v602_v25 = vsel %vm594_vm2, %v592_v21, -inf  ;;  %v1178_v18 = vld [vmem:[%s1665_s4 + $0x8] sm:$0xf] }
  0x1d   : > { %612 = vadd.xlane.f32.xlu1 %v611_v22  ;;  %596 = vadd.xlane.f32.xlu0 %v595_v23  ;;  %v624_v26 = vsel %vm590_vm1, %v582_v16, -inf  ;;  %v623_v27 = vsel %vm590_vm1, %v582_v16, 0.0  ;;  %v640_v31 = vsel %vm590_vm1, %v584_v28, -inf  ;;  %v639_v32 = vsel %vm590_vm1, %v584_v28, 0.0 }
  0x1e   : > { %v634_v29 = vsel %vm594_vm2, %v624_v26, -inf  ;;  %v627_v30 = vsel %vm594_vm2, %v623_v27, 0.0  ;;  %v650_v33 = vsel %vm594_vm2, %v640_v31, -inf  ;;  %v643_v34 = vsel %vm594_vm2, %v639_v32, 0.0 }
  0x21   : > { %619 = vmax.xlane.f32.xlu1 %v618_v24  ;;  %603 = vmax.xlane.f32.xlu0 %v602_v25 }
  0x25   : > { %635 = vmax.xlane.f32.xlu1 %v634_v29  ;;  %628 = vadd.xlane.f32.xlu0 %v627_v30  ;;  %v1184_v30 = vld [vmem:[%s1665_s4 + $0x1c] sm:$0xf] }
  0x29   : > { %651 = vmax.xlane.f32.xlu1 %v650_v33  ;;  %644 = vadd.xlane.f32.xlu0 %v643_v34  ;;  %v1179_v34 = vld [vmem:[%s1665_s4 + $0xc] sm:$0xf] }
  0xaa   : > { %v613_v38 = vpop.xlane.xlu1 %612  ;;  %v597_v39 = vpop.xlane.xlu0 %596 }
  0xab   : > { %v614_v40 = vadd.f32 %v613_v38, %v610_v36  ;;  %v598_v41 = vadd.f32 %v597_v39, %v593_v37 }
  0xad   : > { %615 = vst.msk [vmem:[#allocation2 + $0x4] sm:$0xf] %vm560_vm0, %v614_v40  ;;  %600 = vst.msk [vmem:[#allocation2] sm:$0xf] %vm560_vm0, %v598_v41 }
  0xae   : > { %v620_v44 = vpop.xlane.xlu1 %619  ;;  %v604_v45 = vpop.xlane.xlu0 %603 }
  0xaf   : > { %v621_v46 = vmax.f32 %v617_v42, %v620_v44  ;;  %v605_v47 = vmax.f32 %v601_v43, %v604_v45 }
  0xb1   : > { %622 = vst.msk [vmem:[#allocation3 + $0x4] sm:$0xf] %vm560_vm0, %v621_v46  ;;  %606 = vst.msk [vmem:[#allocation3] sm:$0xf] %vm560_vm0, %v605_v47 }
  0xb2   : > { %v636_v50 = vpop.xlane.xlu1 %635  ;;  %v629_v51 = vpop.xlane.xlu0 %628 }
  0xb3   : > { %v637_v54 = vmax.f32 %v633_v48, %v636_v50  ;;  %v630_v55 = vadd.f32 %v629_v51, %v626_v49 }
  0xb4   : > { %v660_v57 = vld [vmem:[#allocation2 + $0x4] sm:$0xf]  ;;  %v658_v58 = vld [vmem:[#allocation2] sm:$0xf] }
  0xb5   : > { %v1451_v60 = vmul.f32 0.015625, %v660_v57  ;;  %v1453_v61 = vmul.f32 0.015625, %v658_v58  ;;  %638 = vst.msk [vmem:[#allocation3 + $0x8] sm:$0xf] %vm560_vm0, %v637_v54  ;;  %631 = vst.msk [vmem:[#allocation2 + $0x8] sm:$0xf] %vm560_vm0, %v630_v55 }
  0xb6   : > { %v652_v0 = vpop.xlane.xlu1 %651  ;;  %v645_v2 = vpop.xlane.xlu0 %644  ;;  %v1180_v54 = vld [vmem:[%s1666_s5 + $0x1] sm:$0x1] }
  0xb7   : > { %v683_v3 = vmul.f32 %v1177_v52, %v1451_v60  ;;  %v672_v4 = vmul.f32 %v671_v53, %v1453_v61  ;;  %v653_v5 = vmax.f32 %v649_v56, %v652_v0  ;;  %v646_v6 = vadd.f32 %v645_v2, %v642_v59  ;;  %v670_v0 = vld [vmem:[%s1666_s5] sm:$0x1] }
  0xb8   : > { %v1465_v7 = vld [vmem:[#allocation3 + $0x4] sm:$0xf]  ;;  %v1467_v8 = vld [vmem:[#allocation3] sm:$0xf] }
  0xb9   : > { %v684_v9 = vsel %vm560_vm0, %v683_v3, 0.0  ;;  %v673_v10 = vsel %vm560_vm0, %v672_v4, 0.0  ;;  %v746_v11 = vmul.f32 %v1182_v62, %v1465_v7  ;;  %v735_v12 = vmul.f32 %v1181_v63, %v1467_v8  ;;  %654 = vst.msk [vmem:[#allocation3 + $0xc] sm:$0xf] %vm560_vm0, %v653_v5  ;;  %647 = vst.msk [vmem:[#allocation2 + $0xc] sm:$0xf] %vm560_vm0, %v646_v6 }
  0xba   : > { %v685_v13 = vrot.slane %v684_v9, 4  ;;  %v674_v14 = vrot.slane %v673_v10, 4 }
  0xbb   : > { %v747_v16 = vsel %vm560_vm0, %v746_v11, 0.0  ;;  %v736_v17 = vsel %vm560_vm0, %v735_v12, 0.0 }
  0xbc   : > { %v686_v19 = vadd.f32 %v685_v13, %v684_v9  ;;  %v675_v20 = vadd.f32 %v674_v14, %v673_v10  ;;  %v748_v21 = vrot.slane %v747_v16, 4  ;;  %v737_v22 = vrot.slane %v736_v17, 4  ;;  %v1483_v23 = vld [vmem:[#allocation3 + $0x8] sm:$0xf]  ;;  %v662_v24 = vld [vmem:[#allocation2 + $0x8] sm:$0xf] }
  0xbd   : > { %v757_v25 = vmul.f32 %v1183_v15, %v1483_v23  ;;  %v1486_v26 = vmul.f32 0.015625, %v662_v24 }
  0xbe   : > { %v676_v27 = vrot.slane %v675_v20, 2  ;;  %v749_v28 = vadd.f32 %v748_v21, %v747_v16  ;;  %v738_v29 = vadd.f32 %v737_v22, %v736_v17  ;;  %v687_v31 = vrot.slane %v686_v19, 2 }
  0xbf   : > { %v758_v32 = vsel %vm560_vm0, %v757_v25, 0.0  ;;  %v694_v33 = vmul.f32 %v1178_v18, %v1486_v26  ;;  %v718_v22 = vshrl.u32 %v585_v1, 7 }
  0xc0   : > { %v677_v35 = vadd.f32 %v676_v27, %v675_v20  ;;  %v750_v36 = vrot.slane %v749_v28, 2  ;;  %v739_v37 = vrot.slane %v738_v29, 2  ;;  %v1496_v38 = vld [vmem:[#allocation3 + $0xc] sm:$0xf]  ;;  %v664_v39 = vld [vmem:[#allocation2 + $0xc] sm:$0xf]  ;;  %v688_v51 = vadd.f32 %v687_v31, %v686_v19 }
  0xc1   : > { %v759_v40 = vrot.slane %v758_v32, 4  ;;  %v695_v41 = vsel %vm560_vm0, %v694_v33, 0.0  ;;  %v768_v42 = vmul.f32 %v1184_v30, %v1496_v38  ;;  %v1500_v43 = vmul.f32 0.015625, %v664_v39 }
  0xc2   : > { %v678_v44 = vrot.slane %v677_v35, 1  ;;  %v751_v45 = vadd.f32 %v750_v36, %v749_v28  ;;  %v740_v46 = vadd.f32 %v739_v37, %v738_v29  ;;  %v696_v48 = vrot.slane %v695_v41, 4  ;;  %v1185_v37 = vld [vmem:[%s1667_s6 + $0x4] sm:$0xf] }
  0xc3   : > { %v760_v47 = vadd.f32 %v759_v40, %v758_v32  ;;  %v769_v49 = vsel %vm560_vm0, %v768_v42, 0.0  ;;  %v705_v50 = vmul.f32 %v1179_v34, %v1500_v43  ;;  %v689_v5 = vrot.slane %v688_v51, 1  ;;  %v715_v40 = vld [vmem:[%s1667_s6] sm:$0xf] }
  0xc4   : > { %v752_v52 = vrot.slane %v751_v45, 1  ;;  %v741_v53 = vrot.slane %v740_v46, 1  ;;  %v697_v56 = vadd.f32 %v696_v48, %v695_v41  ;;  %v770_v57 = vrot.slane %v769_v49, 4  ;;  %v1186_v41 = vld [vmem:[%s1668_s7 + $0x4] sm:$0xf] }
  0xc5   : > { %v761_v55 = vrot.slane %v760_v47, 2  ;;  %v706_v58 = vsel %vm560_vm0, %v705_v50, 0.0  ;;  %v679_v59 = vadd.f32 %v678_v44, %v677_v35  ;;  %v690_v20 = vadd.f32 %v689_v5, %v688_v51  ;;  %v1199_v5 = vld [vmem:[%s1669_s8 + $0x18] sm:$0xf] }
  0xc6   : > { %v742_v62 = vadd.f32 %v741_v53, %v740_v46  ;;  %v707_v63 = vrot.slane %v706_v58, 4  ;;  %v698_v3 = vrot.slane %v697_v56, 2  ;;  %v771_v4 = vadd.f32 %v770_v57, %v769_v49 }
  0xc7   : > { %v762_v2 = vadd.f32 %v761_v55, %v760_v47  ;;  %v753_v10 = vadd.f32 %v752_v52, %v751_v45  ;;  %v680_v14 = vadd.f32 %v679_v59, %v670_v0  ;;  %v1512_v33 = vsub.s32 0, %v718_v22  ;;  %v724_v45 = vld [vmem:[%s1668_s7] sm:$0xf]  ;;  %v1188_v0 = vld [vmem:[%s1669_s8 + $0x8] sm:$0xf] }
  0xc8   : > { %v743_v6 = vadd.f32 %v1180_v54, %v742_v62  ;;  %v708_v9 = vadd.f32 %v707_v63, %v706_v58  ;;  %v699_v12 = vadd.f32 %v698_v3, %v697_v56  ;;  %v772_v13 = vrot.slane %v771_v4, 2  ;;  %v806_v59 = vld [vmem:[%s1669_s8] sm:$0xf]  ;;  %v1187_v62 = vld [vmem:[%s1669_s8 + $0x4] sm:$0xf] }
  0xc9   : > { %v763_v11 = vrot.slane %v762_v2, 1  ;;  %v691_v27 = vadd.f32 %v690_v20, %v680_v14  ;;  %v1197_v3 = vld [vmem:[%s1669_s8 + $0x10] sm:$0xf] }
  0xca   : > { %v709_v15 = vrot.slane %v708_v9, 2  ;;  %v754_v16 = vadd.f32 %v753_v10, %v743_v6  ;;  %v700_v18 = vrot.slane %v699_v12, 1  ;;  %v773_v19 = vadd.f32 %v772_v13, %v771_v4  ;;  %v1198_v4 = vld [vmem:[%s1669_s8 + $0x14] sm:$0xf]  ;;  %v1200_v6 = vld [vmem:[%s1669_s8 + $0x1c] sm:$0xf] }
  0xcb   : > { %v764_v17 = vadd.f32 %v763_v11, %v762_v2  ;;  %v1189_v2 = vld [vmem:[%s1669_s8 + $0xc] sm:$0xf] }
  0xcc   : > { %v710_v21 = vadd.f32 %v709_v15, %v708_v9  ;;  %v701_v24 = vadd.f32 %v700_v18, %v699_v12  ;;  %v774_v25 = vrot.slane %v773_v19, 1 }
  0xcd   : > { %v765_v29 = vadd.f32 %v764_v17, %v754_v16 }
  0xce   : > { %v711_v28 = vrot.slane %v710_v21, 1  ;;  %v775_v30 = vadd.f32 %v774_v25, %v773_v19  ;;  %v702_v31 = vadd.f32 %v701_v24, %v691_v27 }
  0xd0   : > { %v712_v32 = vadd.f32 %v711_v28, %v710_v21  ;;  %v776_v34 = vadd.f32 %v775_v30, %v765_v29 }
  0xd2   : > { %v713_v35 = vadd.f32 %v712_v32, %v702_v31  ;;  %v777_v36 = vmax.f32 %v776_v34, 0.0 }
  0xd4   : > { %v714_v39 = vmax.f32 %v713_v35, 0.0  ;;  %v784_v1 = vrot.slane %v777_v36, %v1512_v33 }
  0xd6   : > { %v720_v42 = vrot.slane %v714_v39, %v1512_v33  ;;  %v786_v44 = vmul.f32 %v1185_v37, %v784_v1 }
  0xd8   : > { %v722_v46 = vmul.f32 %v720_v42, %v715_v40  ;;  %v790_v47 = vadd.f32 %v1186_v41, %v786_v44 }
  0xda   : > { %v725_v48 = vadd.f32 %v724_v45, %v722_v46  ;;  %v791_v49 = vsub.f32 0.0, %v790_v47 }
  0xdc   : > { %v726_v50 = vsub.f32 0.0, %v725_v48  ;;  %v792_v51 = vmul.f32 1.442695, %v791_v49 }
  0xde   : > { %v727_v52 = vmul.f32 1.442695, %v726_v50  ;;  %1241 = vpow2.f32 %v792_v51 }
  0xe0   : > { %1243 = vpow2.f32 %v727_v52 }
  0xe8   : > { %v1242_v53 = vpop.eup %1241 }
  0xe9   : > { %v794_v55 = vadd.f32 1.0, %v1242_v53 }
  0xea   : > { %v1244_v54 = vpop.eup %1243 }
  0xeb   : > { %v729_v56 = vadd.f32 1.0, %v1244_v54  ;;  %1245 = vrcp.f32 %v794_v55 }
  0xed   : > { %1247 = vrcp.f32 %v729_v56 }
  0xf5   : > { %v1246_v57 = vpop.eup %1245 }
  0xf7   : > { %v1248_v58 = vpop.eup %1247 }
  0xf8   : > { %v1538_v63 = vadd.f32 %v1248_v58, %v1246_v57 }
  0xfa   : > { %v797_v9 = vmul.f32 %v1538_v63, %v1453_v61  ;;  %v798_v10 = vmul.f32 %v1538_v63, %v1451_v60  ;;  %v799_v11 = vmul.f32 %v1538_v63, %v1486_v26  ;;  %v800_v12 = vmul.f32 %v1538_v63, %v1500_v43  ;;  %1003 = vst.msk [vmem:[%s550_s19] sm:$0xf] %vm560_vm0, %v1538_v63  ;;  %s555_s19 = scalar_lea.vmem %s1674_s13, %s1214_s21 }
  0xfb   : > { %v801_v13 = vmul.f32 %v1538_v63, %v1467_v8  ;;  %v802_v14 = vmul.f32 %v1538_v63, %v1465_v7  ;;  %v803_v61 = vmul.f32 %v1538_v63, %v1483_v23  ;;  %v804_v60 = vmul.f32 %v1538_v63, %v1496_v38 }
  0xfc   : > { %v807_v15 = vmul.f32 %v806_v59, %v797_v9  ;;  %v818_v26 = vmul.f32 %v1187_v62, %v798_v10  ;;  %v829_v16 = vmul.f32 %v1188_v0, %v799_v11  ;;  %v840_v17 = vmul.f32 %v1189_v2, %v800_v12  ;;  %v805_v59 = vld [vmem:[%s1670_s9] sm:$0x1]  ;;  %v1196_v10 = vld [vmem:[%s1670_s9 + $0x1] sm:$0x1] }
  0xfd   : > { %v906_v43 = vmul.f32 %v1197_v3, %v801_v13  ;;  %v917_v18 = vmul.f32 %v1198_v4, %v802_v14  ;;  %v928_v19 = vmul.f32 %v1199_v5, %v803_v61  ;;  %v939_v20 = vmul.f32 %v1200_v6, %v804_v60 }
  0xfe   : > { %v808_v21 = vsel %vm560_vm0, %v807_v15, 0.0  ;;  %v819_v8 = vsel %vm560_vm0, %v818_v26, 0.0  ;;  %v830_v7 = vsel %vm560_vm0, %v829_v16, 0.0  ;;  %v841_v22 = vsel %vm560_vm0, %v840_v17, 0.0 }
  0xff   : > { %v809_v23 = vrot.slane %v808_v21, 4  ;;  %v820_v24 = vrot.slane %v819_v8, 4  ;;  %v831_v25 = vrot.slane %v830_v7, 4  ;;  %v842_v38 = vrot.slane %v841_v22, 4 }
 0x100   : > { %v907_v27 = vsel %vm560_vm0, %v906_v43, 0.0  ;;  %v918_v28 = vsel %vm560_vm0, %v917_v18, 0.0  ;;  %v929_v29 = vsel %vm560_vm0, %v928_v19, 0.0  ;;  %v940_v30 = vsel %vm560_vm0, %v939_v20, 0.0 }
 0x101   : > { %v810_v31 = vadd.f32 %v809_v23, %v808_v21  ;;  %v821_v32 = vadd.f32 %v820_v24, %v819_v8  ;;  %v832_v34 = vadd.f32 %v831_v25, %v830_v7  ;;  %v843_v35 = vadd.f32 %v842_v38, %v841_v22  ;;  %v850_v22 = vld [vmem:[%s1671_s10] sm:$0xf]  ;;  %v1190_v24 = vld [vmem:[%s1671_s10 + $0x4] sm:$0xf]  ;;  %v1192_v25 = vld [vmem:[%s1671_s10 + $0x8] sm:$0xf] }
 0x102   : > { %v908_v36 = vrot.slane %v907_v27, 4  ;;  %v919_v37 = vrot.slane %v918_v28, 4  ;;  %v930_v39 = vrot.slane %v929_v29, 4  ;;  %v941_v1 = vrot.slane %v940_v30, 4  ;;  %v1194_v38 = vld [vmem:[%s1671_s10 + $0xc] sm:$0xf] }
 0x103   : > { %v811_v40 = vrot.slane %v810_v31, 2  ;;  %v822_v41 = vrot.slane %v821_v32, 2  ;;  %v833_v42 = vrot.slane %v832_v34, 2  ;;  %v844_v44 = vrot.slane %v843_v35, 2 }
 0x104   : > { %v909_v45 = vadd.f32 %v908_v36, %v907_v27  ;;  %v920_v46 = vadd.f32 %v919_v37, %v918_v28  ;;  %v931_v47 = vadd.f32 %v930_v39, %v929_v29  ;;  %v942_v48 = vadd.f32 %v941_v1, %v940_v30  ;;  %v859_v28 = vld [vmem:[%s1672_s11] sm:$0xf]  ;;  %v1191_v29 = vld [vmem:[%s1672_s11 + $0x4] sm:$0xf]  ;;  %v1193_v30 = vld [vmem:[%s1672_s11 + $0x8] sm:$0xf] }
 0x105   : > { %v812_v49 = vadd.f32 %v811_v40, %v810_v31  ;;  %v823_v50 = vadd.f32 %v822_v41, %v821_v32  ;;  %v834_v51 = vadd.f32 %v833_v42, %v832_v34  ;;  %v845_v58 = vadd.f32 %v844_v44, %v843_v35  ;;  %v1195_v32 = vld [vmem:[%s1672_s11 + $0xc] sm:$0xf]  ;;  %v1201_v34 = vld [vmem:[%s1671_s10 + $0x10] sm:$0xf]  ;;  %v1203_v36 = vld [vmem:[%s1671_s10 + $0x14] sm:$0xf] }
 0x106   : > { %v910_v52 = vrot.slane %v909_v45, 2  ;;  %v921_v53 = vrot.slane %v920_v46, 2  ;;  %v932_v54 = vrot.slane %v931_v47, 2  ;;  %v943_v55 = vrot.slane %v942_v48, 2  ;;  %v1205_v37 = vld [vmem:[%s1671_s10 + $0x18] sm:$0xf] }
 0x107   : > { %v813_v56 = vrot.slane %v812_v49, 1  ;;  %v824_v57 = vrot.slane %v823_v50, 1  ;;  %v835_v4 = vrot.slane %v834_v51, 1  ;;  %v846_v13 = vrot.slane %v845_v58, 1  ;;  %v1207_v39 = vld [vmem:[%s1671_s10 + $0x1c] sm:$0xf] }
 0x108   : > { %v911_v62 = vadd.f32 %v910_v52, %v909_v45  ;;  %v922_v0 = vadd.f32 %v921_v53, %v920_v46  ;;  %v933_v2 = vadd.f32 %v932_v54, %v931_v47  ;;  %v944_v9 = vadd.f32 %v943_v55, %v942_v48  ;;  %v1202_v44 = vld [vmem:[%s1672_s11 + $0x10] sm:$0xf]  ;;  %v1204_v46 = vld [vmem:[%s1672_s11 + $0x14] sm:$0xf]  ;;  %v1206_v47 = vld [vmem:[%s1672_s11 + $0x18] sm:$0xf] }
 0x109   : > { %v814_v3 = vadd.f32 %v813_v56, %v812_v49  ;;  %v825_v12 = vadd.f32 %v824_v57, %v823_v50  ;;  %v836_v15 = vadd.f32 %v835_v4, %v834_v51  ;;  %v847_v18 = vadd.f32 %v846_v13, %v845_v58  ;;  %v1208_v48 = vld [vmem:[%s1672_s11 + $0x1c] sm:$0xf] }
 0x10a   : > { %v912_v5 = vrot.slane %v911_v62, 1  ;;  %v923_v6 = vrot.slane %v922_v0, 1  ;;  %v934_v61 = vrot.slane %v933_v2, 1  ;;  %v945_v17 = vrot.slane %v944_v9, 1 }
 0x10b   : > { %v815_v11 = vadd.f32 %v814_v3, %v805_v59 }
 0x10c   : > { %v913_v14 = vadd.f32 %v912_v5, %v911_v62  ;;  %v924_v16 = vadd.f32 %v923_v6, %v922_v0  ;;  %v935_v20 = vadd.f32 %v934_v61, %v933_v2  ;;  %v946_v7 = vadd.f32 %v945_v17, %v944_v9 }
 0x10d   : > { %v826_v60 = vadd.f32 %v825_v12, %v815_v11 }
 0x10e   : > { %v914_v26 = vadd.f32 %v1196_v10, %v913_v14 }
 0x10f   : > { %v837_v43 = vadd.f32 %v836_v15, %v826_v60 }
 0x110   : > { %v925_v19 = vadd.f32 %v924_v16, %v914_v26 }
 0x111   : > { %v848_v21 = vadd.f32 %v847_v18, %v837_v43 }
 0x112   : > { %v936_v8 = vadd.f32 %v935_v20, %v925_v19 }
 0x113   : > { %v849_v23 = vmax.f32 %v848_v21, 0.0 }
 0x114   : > { %v947_v27 = vadd.f32 %v946_v7, %v936_v8 }
 0x115   : > { %v855_v31 = vrot.slane %v849_v23, %v1512_v33 }
 0x116   : > { %v948_v35 = vmax.f32 %v947_v27, 0.0 }
 0x117   : > { %v857_v1 = vmul.f32 %v855_v31, %v850_v22  ;;  %v868_v40 = vmul.f32 %v1190_v24, %v855_v31  ;;  %v880_v41 = vmul.f32 %v1192_v25, %v855_v31  ;;  %v892_v42 = vmul.f32 %v1194_v38, %v855_v31 }
 0x118   : > { %v955_v45 = vrot.slane %v948_v35, %v1512_v33 }
 0x119   : > { %v860_v49 = vadd.f32 %v859_v28, %v857_v1  ;;  %v872_v50 = vadd.f32 %v1191_v29, %v868_v40  ;;  %v884_v51 = vadd.f32 %v1193_v30, %v880_v41  ;;  %v896_v52 = vadd.f32 %v1195_v32, %v892_v42 }
 0x11a   : > { %v957_v53 = vmul.f32 %v1201_v34, %v955_v45  ;;  %v969_v54 = vmul.f32 %v1203_v36, %v955_v45  ;;  %v981_v55 = vmul.f32 %v1205_v37, %v955_v45  ;;  %v993_v33 = vmul.f32 %v1207_v39, %v955_v45 }
 0x11b   : > { %v861_v56 = vsub.f32 0.0, %v860_v49  ;;  %v873_v57 = vsub.f32 0.0, %v872_v50  ;;  %v885_v58 = vsub.f32 0.0, %v884_v51  ;;  %v897_v59 = vsub.f32 0.0, %v896_v52 }
 0x11c   : > { %v961_v62 = vadd.f32 %v1202_v44, %v957_v53  ;;  %v973_v0 = vadd.f32 %v1204_v46, %v969_v54  ;;  %v985_v2 = vadd.f32 %v1206_v47, %v981_v55  ;;  %v997_v3 = vadd.f32 %v1208_v48, %v993_v33 }
 0x11d   : > { %v862_v4 = vmul.f32 1.442695, %v861_v56  ;;  %v874_v5 = vmul.f32 1.442695, %v873_v57  ;;  %v886_v6 = vmul.f32 1.442695, %v885_v58 }
 0x11e   : > { %v898_v9 = vmul.f32 1.442695, %v897_v59  ;;  %v962_v10 = vsub.f32 0.0, %v961_v62  ;;  %v974_v11 = vsub.f32 0.0, %v973_v0  ;;  %v986_v12 = vsub.f32 0.0, %v985_v2 }
 0x11f   : > { %1249 = vpow2.f32 %v862_v4  ;;  %v998_v13 = vsub.f32 0.0, %v997_v3 }
 0x120   : > { %1251 = vpow2.f32 %v874_v5  ;;  %v963_v14 = vmul.f32 1.442695, %v962_v10  ;;  %v975_v61 = vmul.f32 1.442695, %v974_v11  ;;  %v987_v60 = vmul.f32 1.442695, %v986_v12 }
 0x121   : > { %1253 = vpow2.f32 %v886_v6  ;;  %v999_v15 = vmul.f32 1.442695, %v998_v13 }
 0x122   : > { %1255 = vpow2.f32 %v898_v9 }
 0x123   : > { %1257 = vpow2.f32 %v963_v14 }
 0x124   : > { %1259 = vpow2.f32 %v975_v61 }
 0x125   : > { %1261 = vpow2.f32 %v987_v60 }
 0x126   : > { %1263 = vpow2.f32 %v999_v15 }
 0x129   : > { %v1250_v26 = vpop.eup %1249 }
 0x12a   : > { %v1252_v16 = vpop.eup %1251  ;;  %v864_v17 = vadd.f32 1.0, %v1250_v26 }
 0x12b   : > { %v1254_v43 = vpop.eup %1253  ;;  %v876_v18 = vadd.f32 1.0, %v1252_v16 }
 0x12c   : > { %v1256_v19 = vpop.eup %1255  ;;  %1265 = vrcp.f32 %v864_v17  ;;  %v888_v20 = vadd.f32 1.0, %v1254_v43 }
 0x12d   : > { %v1258_v21 = vpop.eup %1257  ;;  %1267 = vrcp.f32 %v876_v18  ;;  %v900_v8 = vadd.f32 1.0, %v1256_v19 }
 0x12e   : > { %v1260_v7 = vpop.eup %1259  ;;  %1269 = vrcp.f32 %v888_v20  ;;  %v965_v22 = vadd.f32 1.0, %v1258_v21 }
 0x12f   : > { %v1262_v23 = vpop.eup %1261  ;;  %1271 = vrcp.f32 %v900_v8  ;;  %v977_v24 = vadd.f32 1.0, %v1260_v7 }
 0x130   : > { %v1264_v25 = vpop.eup %1263  ;;  %1273 = vrcp.f32 %v965_v22  ;;  %v989_v38 = vadd.f32 1.0, %v1262_v23 }
 0x131   : > { %1275 = vrcp.f32 %v977_v24  ;;  %v1001_v27 = vadd.f32 1.0, %v1264_v25 }
 0x132   : > { %1277 = vrcp.f32 %v989_v38 }
 0x133   : > { %1279 = vrcp.f32 %v1001_v27 }
 0x136   : > { %v1266_v28 = vpop.eup %1265 }
 0x137   : > { %v1268_v29 = vpop.eup %1267 }
 0x138   : > { %v1270_v30 = vpop.eup %1269 }
 0x139   : > { %v1272_v31 = vpop.eup %1271 }
 0x13a   : > { %v1274_v32 = vpop.eup %1273 }
 0x13b   : > { %v1276_v34 = vpop.eup %1275  ;;  %v1004_v35 = vadd.f32 %v1274_v32, %v1266_v28 }
 0x13c   : > { %v1278_v36 = vpop.eup %1277  ;;  %v1008_v37 = vadd.f32 %v1276_v34, %v1268_v29 }
 0x13d   : > { %v1280_v39 = vpop.eup %1279  ;;  %v1005_v1 = vmul.f32 %v1004_v35, %v1538_v63  ;;  %v1013_v40 = vadd.f32 %v1278_v36, %v1270_v30 }
 0x13e   : > { %v1009_v41 = vmul.f32 %v1008_v37, %v1538_v63  ;;  %v1018_v42 = vadd.f32 %v1280_v39, %v1272_v31 }
 0x13f   : > { %v1006_v44 = vmul.f32 0.25, %v1005_v1  ;;  %v1014_v45 = vmul.f32 %v1013_v40, %v1538_v63 }
 0x140   : > { %v1010_v46 = vmul.f32 0.25, %v1009_v41  ;;  %v1019_v47 = vmul.f32 %v1018_v42, %v1538_v63 }
 0x141   : > { %1007 = vst.msk [vmem:[%s555_s19] sm:$0xf] %vm560_vm0, %v1006_v44  ;;  %v1015_v48 = vmul.f32 0.25, %v1014_v45 }
 0x142   : > { %1209 = vst.msk [vmem:[%s555_s19 + $0x4] sm:$0xf] %vm560_vm0, %v1010_v46  ;;  %v1020_v49 = vmul.f32 0.25, %v1019_v47 }
 0x143   : > { %1210 = vst.msk [vmem:[%s555_s19 + $0x8] sm:$0xf] %vm560_vm0, %v1015_v48 }
 0x144   : > { %1211 = vst.msk [vmem:[%s555_s19 + $0xc] sm:$0xf] %vm560_vm0, %v1020_v49 }
 0x145 PF: > { %s24_s27 = sadd.s32 1, %s1303_s27   ;;  %s1675_s25 = smov %s1299_s26 }
 0x146   : > { %p21_p5 = scmp.ge.s32.totalorder %s24_s27, 4   ;;  %s1676_s26 = smov %s1678_s28 }
 0x148   :  { %23 = sbr.rel (!%p21_p5) target bundleno = 2 (0x2), region = 168 }

</bundles_post_ra>
